<compile_context>
chip_gen: v6e
topology: v6e:2x2x1
jax: 0.10.0
libtpu: 0.0.40
codegen_flags: <defaults>
</compile_context>

<pallas_src>
import functools

import numpy as np
import jax
import jax.numpy as jnp
from jax import lax
from jax.experimental import pallas as pl
from jax.experimental.pallas import tpu as pltpu

EPS = 1e-5


# ---------------------------------------------------------------------------
# Fused Pallas kernel: conv1+bn1+relu -> (shortcut) -> conv2+bn2+add+relu
# ---------------------------------------------------------------------------
def _resnet_block_kernel(x_ref, m1_ref, m2_ref, w1_ref, b1_ref, w2_ref,
                         b2_ref, wsc_ref, bsc_ref, out_ref, *,
                         stride, has_shortcut, H, W, Ho, Wo, Bt):
    """Bt batch elements per grid step, channels-first, lane-flat spatial.

    x_ref   : (Bt, Cin, H*W)    compute-dtype input (NCHW, spatial flattened)
    m1_ref  : (9, 1, H*W)       conv1 per-tap edge masks ({0,1}, compute dtype)
    m2_ref  : (9, 1, Ho*Wo)     conv2 per-tap edge masks
    w1_ref  : (9, Cout, Cin)    BN1-folded conv1 weights (tap-major dy,dx)
    w2_ref  : (9, Cout, Cout)   BN2-folded conv2 weights
    wsc_ref : (Cout, Cin)       BN-folded 1x1 shortcut weights
    b*_ref  : (Cout, 1)         folded BN biases (f32)
    out_ref : (Bt, Cout, Ho*Wo) output
    """
    cdt = x_ref.dtype                       # MXU / activation dtype
    HoWo = Ho * Wo

    def shift_lanes(a, off, hw):
        # out[:, j] = a[:, j + off] if 0 <= j + off < hw else 0   (static off)
        if off == 0:
            return a
        c = a.shape[0]
        z = jnp.zeros((c, abs(off)), a.dtype)
        if off > 0:
            return jnp.concatenate([a[:, off:], z], axis=1)
        return jnp.concatenate([z, a[:, :hw + off]], axis=1)

    def conv3x3(a, w_ref, m_ref, h, w):
        # Dense 3x3 / pad=1 / stride=1 conv on a lane-flat (C, h*w) map:
        # 9 shifted + edge-masked accumulating matmuls, f32 accumulator.
        hw = h * w
        acc = None
        for t in range(9):
            dy, dx = t // 3, t % 3
            off = (dy - 1) * w + (dx - 1)
            tap = shift_lanes(a, off, hw) * m_ref[t]            # (C, hw) cdt
            part = jnp.dot(w_ref[t], tap,
                           preferred_element_type=jnp.float32)  # (Cout, hw)
            acc = part if acc is None else acc + part
        return acc

    for b in range(Bt):                     # unrolled batch-tile loop
        x2d = x_ref[b]                                          # (Cin, HW)

        # ---- conv1 (3x3, dense) + folded bn1 + relu ------------------------
        y1 = jnp.maximum(conv3x3(x2d, w1_ref, m1_ref, H, W) + b1_ref[...], 0.0)
        if stride > 1:
            # TODO(synk): non-fast path (strided decimation); use an even/odd
            # column-phase split for production stride-2 blocks.
            y1 = y1.reshape(-1, H, W)[:, ::stride, ::stride].reshape(-1, HoWo)
        y1c = y1.astype(cdt)                # stays vreg-resident for conv2

        # ---- shortcut ------------------------------------------------------
        if has_shortcut:
            xs = x2d
            if stride > 1:
                xs = xs.reshape(-1, H, W)[:, ::stride, ::stride]
                xs = xs.reshape(-1, HoWo)
            sc = jnp.dot(wsc_ref[...], xs,
                         preferred_element_type=jnp.float32) + bsc_ref[...]
        else:
            sc = x2d.astype(jnp.float32)    # identity (Cin==Cout, stride==1)

        # ---- conv2 (3x3, stride 1) + folded bn2 + residual add + relu ------
        y2 = conv3x3(y1c, w2_ref, m2_ref, Ho, Wo) + b2_ref[...]
        out_ref[b] = jnp.maximum(y2 + sc, 0.0).astype(out_ref.dtype)


# ---------------------------------------------------------------------------
# Parameter prep: fold BN (eval mode) into conv weights; per-tap edge masks
# ---------------------------------------------------------------------------
def _fold_3x3(w_oihw, bn, compute_dtype):
    gamma, beta, mean, var = bn
    scale = gamma / jnp.sqrt(var + EPS)                         # (Cout,)
    bias = (beta - mean * scale).reshape(-1, 1).astype(jnp.float32)
    w = w_oihw * scale[:, None, None, None]                     # (O, I, 3, 3)
    w = jnp.transpose(w, (2, 3, 0, 1))                          # (3, 3, O, I)
    w = w.reshape(9, w_oihw.shape[0], w_oihw.shape[1])          # tap-major
    return w.astype(compute_dtype), bias


def _fold_1x1(w_oihw, bn, compute_dtype):
    gamma, beta, mean, var = bn
    scale = gamma / jnp.sqrt(var + EPS)
    bias = (beta - mean * scale).reshape(-1, 1).astype(jnp.float32)
    w = w_oihw[:, :, 0, 0] * scale[:, None]                     # (O, I)
    return w.astype(compute_dtype), bias


def _conv_masks(h, w, dtype):
    """(9, 1, h*w) {0,1} masks; tap (dy,dx) valid iff source pixel in-image."""
    oy = np.arange(h).reshape(h, 1)
    ox = np.arange(w).reshape(1, w)
    masks = []
    for dy in range(3):
        for dx in range(3):
            iy, ix = oy + dy - 1, ox + dx - 1
            m = (iy >= 0) & (iy < h) & (ix >= 0) & (ix < w)
            masks.append(np.broadcast_to(m, (h, w)).reshape(1, h * w))
    return jnp.asarray(np.stack(masks, 0), dtype=dtype)


# ---------------------------------------------------------------------------
# ResnetBlock forward (NCHW in / NCHW out, matching PyTorch)
# ---------------------------------------------------------------------------
def resnet_block_forward(x_nchw, params, stride, compute_dtype=jnp.bfloat16,
                         batch_tile=1, out_dtype=jnp.float32):
    N, Cin, H, W = x_nchw.shape
    Cout = params["w1"].shape[0]
    Ho = (H - 1) // stride + 1          # 3x3 conv, pad=1
    Wo = (W - 1) // stride + 1
    has_shortcut = "wsc" in params
    if not has_shortcut:
        assert Cin == Cout and stride == 1, (
            "identity shortcut requires Cin == Cout and stride == 1")
    assert N % batch_tile == 0, "batch_tile must divide N"
    Bt = batch_tile

    w1, b1 = _fold_3x3(params["w1"], params["bn1"], compute_dtype)
    w2, b2 = _fold_3x3(params["w2"], params["bn2"], compute_dtype)
    if has_shortcut:
        wsc, bsc = _fold_1x1(params["wsc"], params["bnsc"], compute_dtype)
    else:
        wsc = jnp.zeros((Cout, Cin), compute_dtype)             # unused dummy
        bsc = jnp.zeros((Cout, 1), jnp.float32)

    m1 = _conv_masks(H, W, compute_dtype)                       # conv1 masks
    m2 = _conv_masks(Ho, Wo, compute_dtype)                     # conv2 masks

    # Activations DMA'd in the compute dtype (bf16 halves HBM traffic); the
    # reshape to a lane-dense (C, H*W) layout is free.
    x_flat = x_nchw.reshape(N, Cin, H * W).astype(compute_dtype)

    kern = functools.partial(
        _resnet_block_kernel, stride=stride, has_shortcut=has_shortcut,
        H=H, W=W, Ho=Ho, Wo=Wo, Bt=Bt)

    out = pl.pallas_call(
        kern,
        out_shape=jax.ShapeDtypeStruct((N, Cout, Ho * Wo), out_dtype),
        grid=(N // Bt,),
        in_specs=[
            pl.BlockSpec((Bt, Cin, H * W), lambda n: (n, 0, 0)),
            pl.BlockSpec((9, 1, H * W), lambda n: (0, 0, 0)),
            pl.BlockSpec((9, 1, Ho * Wo), lambda n: (0, 0, 0)),
            pl.BlockSpec((9, Cout, Cin), lambda n: (0, 0, 0)),
            pl.BlockSpec((Cout, 1), lambda n: (0, 0)),
            pl.BlockSpec((9, Cout, Cout), lambda n: (0, 0, 0)),
            pl.BlockSpec((Cout, 1), lambda n: (0, 0)),
            pl.BlockSpec((Cout, Cin), lambda n: (0, 0)),
            pl.BlockSpec((Cout, 1), lambda n: (0, 0)),
        ],
        out_specs=pl.BlockSpec((Bt, Cout, Ho * Wo), lambda n: (n, 0, 0)),
        compiler_params=pltpu.CompilerParams(
            dimension_semantics=("parallel",)),
    )(x_flat, m1, m2, w1, b1, w2, b2, wsc, bsc)

    return out.reshape(N, Cout, Ho, Wo)                         # free reshape


# ---------------------------------------------------------------------------
# Pure-JAX reference (mirrors the PyTorch forward, eval-mode BN)
# ---------------------------------------------------------------------------
def resnet_block_ref(x, params, stride):
    def conv(x, w, s, p):
        return lax.conv_general_dilated(
            x, w, (s, s), [(p, p), (p, p)],
            dimension_numbers=("NCHW", "OIHW", "NCHW"))

    def bn(x, stats):
        g, b, m, v = stats
        g, b, m, v = (t[None, :, None, None] for t in (g, b, m, v))
        return (x - m) / jnp.sqrt(v + EPS) * g + b

    out = jax.nn.relu(bn(conv(x, params["w1"], stride, 1), params["bn1"]))
    out = bn(conv(out, params["w2"], 1, 1), params["bn2"])
    if "wsc" in params:
        sc = bn(conv(x, params["wsc"], stride, 0), params["bnsc"])
    else:
        sc = x
    return jax.nn.relu(out + sc)


# ---------------------------------------------------------------------------
def init_params(key, in_planes, planes, stride):
    ks = jax.random.split(key, 12)

    def bn_stats(k, c):
        k0, k1, k2, k3 = jax.random.split(k, 4)
        gamma = 1.0 + 0.1 * jax.random.normal(k0, (c,), jnp.float32)
        beta = 0.1 * jax.random.normal(k1, (c,), jnp.float32)
        mean = 0.1 * jax.random.normal(k2, (c,), jnp.float32)
        var = jax.random.uniform(k3, (c,), jnp.float32, 0.5, 1.5)
        return (gamma, beta, mean, var)

    params = {
        "w1": 0.1 * jax.random.normal(ks[0], (planes, in_planes, 3, 3),
                                      jnp.float32),
        "bn1": bn_stats(ks[1], planes),
        "w2": 0.1 * jax.random.normal(ks[2], (planes, planes, 3, 3),
                                      jnp.float32),
        "bn2": bn_stats(ks[3], planes),
    }
    if stride != 1 or in_planes != planes:
        params["wsc"] = 0.1 * jax.random.normal(
            ks[4], (planes, in_planes, 1, 1), jnp.float32)
        params["bnsc"] = bn_stats(ks[5], planes)
    return params


if __name__ == "__main__":
    key = jax.random.PRNGKey(0)
    k_x, k_p, k_x2, k_p2 = jax.random.split(key, 4)

    # ---- Config A: projection shortcut (in != out), stride 1, batch tile 2 -
    in_planes, planes, stride = 4, 8, 1
    x = jax.random.normal(k_x, (2, in_planes, 16, 16), jnp.float32)   # NCHW
    params = init_params(k_p, in_planes, planes, stride)
    ref = resnet_block_ref(x, params, stride)

    out = jax.block_until_ready(
        resnet_block_forward(x, params, stride, compute_dtype=jnp.bfloat16,
                             batch_tile=2))
    assert out.shape == ref.shape == (2, planes, 16, 16)
    err_bf16 = float(jnp.max(jnp.abs(out - ref)))
    assert jnp.allclose(out, ref, rtol=5e-2, atol=5e-2), err_bf16

    out_f32 = jax.block_until_ready(
        resnet_block_forward(x, params, stride, compute_dtype=jnp.float32,
                             batch_tile=2))
    err_f32 = float(jnp.max(jnp.abs(out_f32 - ref)))
    assert jnp.allclose(out_f32, ref, rtol=2e-2, atol=2e-2), err_f32

    # ---- Config B: identity shortcut (in == out), stride 1, 1 img/step -----
    in_planes2 = planes2 = 8
    x2 = jax.random.normal(k_x2, (2, in_planes2, 16, 16), jnp.float32)
    params2 = init_params(k_p2, in_planes2, planes2, 1)
    ref2 = resnet_block_ref(x2, params2, 1)

    out2 = jax.block_until_ready(
        resnet_block_forward(x2, params2, 1, compute_dtype=jnp.bfloat16,
                             batch_tile=1))
    err2 = float(jnp.max(jnp.abs(out2 - ref2)))
    assert jnp.allclose(out2, ref2, rtol=5e-2, atol=7e-2), err2

    print("KERNEL_OK")
</pallas_src>

<mosaic_0001>
module attributes {stable_mosaic.version = 11 : i64} {
  func.func @_resnet_block_kernel(%arg0: i32, %arg1: memref<2x4x256xbf16, #tpu.memory_space<vmem>>, %arg2: memref<9x1x256xbf16, #tpu.memory_space<vmem>>, %arg3: memref<9x1x256xbf16, #tpu.memory_space<vmem>>, %arg4: memref<9x8x4xbf16, #tpu.memory_space<vmem>>, %arg5: memref<8x1xf32, #tpu.memory_space<vmem>>, %arg6: memref<9x8x8xbf16, #tpu.memory_space<vmem>>, %arg7: memref<8x1xf32, #tpu.memory_space<vmem>>, %arg8: memref<8x4xbf16, #tpu.memory_space<vmem>>, %arg9: memref<8x1xf32, #tpu.memory_space<vmem>>, %arg10: memref<2x8x256xf32, #tpu.memory_space<vmem>>) attributes {dimension_semantics = [#tpu.dimension_semantics<parallel>], iteration_bounds = array<i64: 1>, scalar_prefetch = 0 : i64, scratch_operands = 0 : i64, tpu.core_type = #tpu.core_type<tc>, window_params = [{transform_indices = @transform_0, window_bounds = array<i64: 2, 4, 256>}, {pipeline_mode = #tpu.pipeline_mode<synchronous>, transform_indices = @transform_1, window_bounds = array<i64: 9, 1, 256>}, {pipeline_mode = #tpu.pipeline_mode<synchronous>, transform_indices = @transform_2, window_bounds = array<i64: 9, 1, 256>}, {pipeline_mode = #tpu.pipeline_mode<synchronous>, transform_indices = @transform_3, window_bounds = array<i64: 9, 8, 4>}, {pipeline_mode = #tpu.pipeline_mode<synchronous>, transform_indices = @transform_4, window_bounds = array<i64: 8, 1>}, {pipeline_mode = #tpu.pipeline_mode<synchronous>, transform_indices = @transform_5, window_bounds = array<i64: 9, 8, 8>}, {pipeline_mode = #tpu.pipeline_mode<synchronous>, transform_indices = @transform_6, window_bounds = array<i64: 8, 1>}, {pipeline_mode = #tpu.pipeline_mode<synchronous>, transform_indices = @transform_7, window_bounds = array<i64: 8, 4>}, {pipeline_mode = #tpu.pipeline_mode<synchronous>, transform_indices = @transform_8, window_bounds = array<i64: 8, 1>}, {transform_indices = @transform_9, window_bounds = array<i64: 2, 8, 256>}]} {
    %c0 = arith.constant 0 : index
    %c0_0 = arith.constant 0 : index
    %c0_1 = arith.constant 0 : index
    %0 = vector.load %arg1[%c0, %c0_0, %c0_1] : memref<2x4x256xbf16, #tpu.memory_space<vmem>>, vector<1x4x256xbf16>
    %1 = vector.shape_cast %0 : vector<1x4x256xbf16> to vector<4x256xbf16>
    %cst = arith.constant 0.000000e+00 : bf16
    %2 = vector.broadcast %cst : bf16 to vector<4x17xbf16>
    %3 = vector.extract_strided_slice %1 {offsets = [0, 0], sizes = [4, 239], strides = [1, 1]} : vector<4x256xbf16> to vector<4x239xbf16>
    %4 = tpu.concatenate %2, %3 in 1 : vector<4x17xbf16>, vector<4x239xbf16> -> vector<4x256xbf16>
    %c0_2 = arith.constant 0 : index
    %c0_3 = arith.constant 0 : index
    %c0_4 = arith.constant 0 : index
    %5 = vector.load %arg2[%c0_2, %c0_3, %c0_4] : memref<9x1x256xbf16, #tpu.memory_space<vmem>>, vector<1x1x256xbf16>
    %6 = vector.shape_cast %5 : vector<1x1x256xbf16> to vector<1x256xbf16>
    %7 = vector.broadcast %6 : vector<1x256xbf16> to vector<4x256xbf16>
    %8 = arith.mulf %4, %7 : vector<4x256xbf16>
    %c0_5 = arith.constant 0 : index
    %c0_6 = arith.constant 0 : index
    %c0_7 = arith.constant 0 : index
    %9 = vector.load %arg4[%c0_5, %c0_6, %c0_7] : memref<9x8x4xbf16, #tpu.memory_space<vmem>>, vector<1x8x4xbf16>
    %10 = vector.shape_cast %9 : vector<1x8x4xbf16> to vector<8x4xbf16>
    %cst_8 = arith.constant dense<0.000000e+00> : vector<8x256xf32>
    %11 = tpu.matmul %10, %8, %cst_8 {dimension_numbers = #tpu.dot_dimension_numbers<[1], [0], [0], [1], [0, 0, 1, 1], [], []>} : vector<8x4xbf16>, vector<4x256xbf16>, vector<8x256xf32> -> vector<8x256xf32>
    %cst_9 = arith.constant 0.000000e+00 : bf16
    %12 = vector.broadcast %cst_9 : bf16 to vector<4x16xbf16>
    %13 = vector.extract_strided_slice %1 {offsets = [0, 0], sizes = [4, 240], strides = [1, 1]} : vector<4x256xbf16> to vector<4x240xbf16>
    %14 = tpu.concatenate %12, %13 in 1 : vector<4x16xbf16>, vector<4x240xbf16> -> vector<4x256xbf16>
    %c1 = arith.constant 1 : index
    %c0_10 = arith.constant 0 : index
    %c0_11 = arith.constant 0 : index
    %15 = vector.load %arg2[%c1, %c0_10, %c0_11] : memref<9x1x256xbf16, #tpu.memory_space<vmem>>, vector<1x1x256xbf16>
    %16 = vector.shape_cast %15 : vector<1x1x256xbf16> to vector<1x256xbf16>
    %17 = vector.broadcast %16 : vector<1x256xbf16> to vector<4x256xbf16>
    %18 = arith.mulf %14, %17 : vector<4x256xbf16>
    %c1_12 = arith.constant 1 : index
    %c0_13 = arith.constant 0 : index
    %c0_14 = arith.constant 0 : index
    %19 = vector.load %arg4[%c1_12, %c0_13, %c0_14] : memref<9x8x4xbf16, #tpu.memory_space<vmem>>, vector<1x8x4xbf16>
    %20 = vector.shape_cast %19 : vector<1x8x4xbf16> to vector<8x4xbf16>
    %cst_15 = arith.constant dense<0.000000e+00> : vector<8x256xf32>
    %21 = tpu.matmul %20, %18, %cst_15 {dimension_numbers = #tpu.dot_dimension_numbers<[1], [0], [0], [1], [0, 0, 1, 1], [], []>} : vector<8x4xbf16>, vector<4x256xbf16>, vector<8x256xf32> -> vector<8x256xf32>
    %22 = arith.addf %11, %21 : vector<8x256xf32>
    %cst_16 = arith.constant 0.000000e+00 : bf16
    %23 = vector.broadcast %cst_16 : bf16 to vector<4x15xbf16>
    %24 = vector.extract_strided_slice %1 {offsets = [0, 0], sizes = [4, 241], strides = [1, 1]} : vector<4x256xbf16> to vector<4x241xbf16>
    %25 = tpu.concatenate %23, %24 in 1 : vector<4x15xbf16>, vector<4x241xbf16> -> vector<4x256xbf16>
    %c2 = arith.constant 2 : index
    %c0_17 = arith.constant 0 : index
    %c0_18 = arith.constant 0 : index
    %26 = vector.load %arg2[%c2, %c0_17, %c0_18] : memref<9x1x256xbf16, #tpu.memory_space<vmem>>, vector<1x1x256xbf16>
    %27 = vector.shape_cast %26 : vector<1x1x256xbf16> to vector<1x256xbf16>
    %28 = vector.broadcast %27 : vector<1x256xbf16> to vector<4x256xbf16>
    %29 = arith.mulf %25, %28 : vector<4x256xbf16>
    %c2_19 = arith.constant 2 : index
    %c0_20 = arith.constant 0 : index
    %c0_21 = arith.constant 0 : index
    %30 = vector.load %arg4[%c2_19, %c0_20, %c0_21] : memref<9x8x4xbf16, #tpu.memory_space<vmem>>, vector<1x8x4xbf16>
    %31 = vector.shape_cast %30 : vector<1x8x4xbf16> to vector<8x4xbf16>
    %cst_22 = arith.constant dense<0.000000e+00> : vector<8x256xf32>
    %32 = tpu.matmul %31, %29, %cst_22 {dimension_numbers = #tpu.dot_dimension_numbers<[1], [0], [0], [1], [0, 0, 1, 1], [], []>} : vector<8x4xbf16>, vector<4x256xbf16>, vector<8x256xf32> -> vector<8x256xf32>
    %33 = arith.addf %22, %32 : vector<8x256xf32>
    %cst_23 = arith.constant 0.000000e+00 : bf16
    %34 = vector.broadcast %cst_23 : bf16 to vector<4x1xbf16>
    %35 = vector.extract_strided_slice %1 {offsets = [0, 0], sizes = [4, 255], strides = [1, 1]} : vector<4x256xbf16> to vector<4x255xbf16>
    %36 = tpu.concatenate %34, %35 in 1 : vector<4x1xbf16>, vector<4x255xbf16> -> vector<4x256xbf16>
    %c3 = arith.constant 3 : index
    %c0_24 = arith.constant 0 : index
    %c0_25 = arith.constant 0 : index
    %37 = vector.load %arg2[%c3, %c0_24, %c0_25] : memref<9x1x256xbf16, #tpu.memory_space<vmem>>, vector<1x1x256xbf16>
    %38 = vector.shape_cast %37 : vector<1x1x256xbf16> to vector<1x256xbf16>
    %39 = vector.broadcast %38 : vector<1x256xbf16> to vector<4x256xbf16>
    %40 = arith.mulf %36, %39 : vector<4x256xbf16>
    %c3_26 = arith.constant 3 : index
    %c0_27 = arith.constant 0 : index
    %c0_28 = arith.constant 0 : index
    %41 = vector.load %arg4[%c3_26, %c0_27, %c0_28] : memref<9x8x4xbf16, #tpu.memory_space<vmem>>, vector<1x8x4xbf16>
    %42 = vector.shape_cast %41 : vector<1x8x4xbf16> to vector<8x4xbf16>
    %cst_29 = arith.constant dense<0.000000e+00> : vector<8x256xf32>
    %43 = tpu.matmul %42, %40, %cst_29 {dimension_numbers = #tpu.dot_dimension_numbers<[1], [0], [0], [1], [0, 0, 1, 1], [], []>} : vector<8x4xbf16>, vector<4x256xbf16>, vector<8x256xf32> -> vector<8x256xf32>
    %44 = arith.addf %33, %43 : vector<8x256xf32>
    %c4 = arith.constant 4 : index
    %c0_30 = arith.constant 0 : index
    %c0_31 = arith.constant 0 : index
    %45 = vector.load %arg2[%c4, %c0_30, %c0_31] : memref<9x1x256xbf16, #tpu.memory_space<vmem>>, vector<1x1x256xbf16>
    %46 = vector.shape_cast %45 : vector<1x1x256xbf16> to vector<1x256xbf16>
    %47 = vector.broadcast %46 : vector<1x256xbf16> to vector<4x256xbf16>
    %48 = arith.mulf %1, %47 : vector<4x256xbf16>
    %c4_32 = arith.constant 4 : index
    %c0_33 = arith.constant 0 : index
    %c0_34 = arith.constant 0 : index
    %49 = vector.load %arg4[%c4_32, %c0_33, %c0_34] : memref<9x8x4xbf16, #tpu.memory_space<vmem>>, vector<1x8x4xbf16>
    %50 = vector.shape_cast %49 : vector<1x8x4xbf16> to vector<8x4xbf16>
    %cst_35 = arith.constant dense<0.000000e+00> : vector<8x256xf32>
    %51 = tpu.matmul %50, %48, %cst_35 {dimension_numbers = #tpu.dot_dimension_numbers<[1], [0], [0], [1], [0, 0, 1, 1], [], []>} : vector<8x4xbf16>, vector<4x256xbf16>, vector<8x256xf32> -> vector<8x256xf32>
    %52 = arith.addf %44, %51 : vector<8x256xf32>
    %cst_36 = arith.constant 0.000000e+00 : bf16
    %53 = vector.broadcast %cst_36 : bf16 to vector<4x1xbf16>
    %54 = vector.extract_strided_slice %1 {offsets = [0, 1], sizes = [4, 255], strides = [1, 1]} : vector<4x256xbf16> to vector<4x255xbf16>
    %55 = tpu.concatenate %54, %53 in 1 : vector<4x255xbf16>, vector<4x1xbf16> -> vector<4x256xbf16>
    %c5 = arith.constant 5 : index
    %c0_37 = arith.constant 0 : index
    %c0_38 = arith.constant 0 : index
    %56 = vector.load %arg2[%c5, %c0_37, %c0_38] : memref<9x1x256xbf16, #tpu.memory_space<vmem>>, vector<1x1x256xbf16>
    %57 = vector.shape_cast %56 : vector<1x1x256xbf16> to vector<1x256xbf16>
    %58 = vector.broadcast %57 : vector<1x256xbf16> to vector<4x256xbf16>
    %59 = arith.mulf %55, %58 : vector<4x256xbf16>
    %c5_39 = arith.constant 5 : index
    %c0_40 = arith.constant 0 : index
    %c0_41 = arith.constant 0 : index
    %60 = vector.load %arg4[%c5_39, %c0_40, %c0_41] : memref<9x8x4xbf16, #tpu.memory_space<vmem>>, vector<1x8x4xbf16>
    %61 = vector.shape_cast %60 : vector<1x8x4xbf16> to vector<8x4xbf16>
    %cst_42 = arith.constant dense<0.000000e+00> : vector<8x256xf32>
    %62 = tpu.matmul %61, %59, %cst_42 {dimension_numbers = #tpu.dot_dimension_numbers<[1], [0], [0], [1], [0, 0, 1, 1], [], []>} : vector<8x4xbf16>, vector<4x256xbf16>, vector<8x256xf32> -> vector<8x256xf32>
    %63 = arith.addf %52, %62 : vector<8x256xf32>
    %cst_43 = arith.constant 0.000000e+00 : bf16
    %64 = vector.broadcast %cst_43 : bf16 to vector<4x15xbf16>
    %65 = vector.extract_strided_slice %1 {offsets = [0, 15], sizes = [4, 241], strides = [1, 1]} : vector<4x256xbf16> to vector<4x241xbf16>
    %66 = tpu.concatenate %65, %64 in 1 : vector<4x241xbf16>, vector<4x15xbf16> -> vector<4x256xbf16>
    %c6 = arith.constant 6 : index
    %c0_44 = arith.constant 0 : index
    %c0_45 = arith.constant 0 : index
    %67 = vector.load %arg2[%c6, %c0_44, %c0_45] : memref<9x1x256xbf16, #tpu.memory_space<vmem>>, vector<1x1x256xbf16>
    %68 = vector.shape_cast %67 : vector<1x1x256xbf16> to vector<1x256xbf16>
    %69 = vector.broadcast %68 : vector<1x256xbf16> to vector<4x256xbf16>
    %70 = arith.mulf %66, %69 : vector<4x256xbf16>
    %c6_46 = arith.constant 6 : index
    %c0_47 = arith.constant 0 : index
    %c0_48 = arith.constant 0 : index
    %71 = vector.load %arg4[%c6_46, %c0_47, %c0_48] : memref<9x8x4xbf16, #tpu.memory_space<vmem>>, vector<1x8x4xbf16>
    %72 = vector.shape_cast %71 : vector<1x8x4xbf16> to vector<8x4xbf16>
    %cst_49 = arith.constant dense<0.000000e+00> : vector<8x256xf32>
    %73 = tpu.matmul %72, %70, %cst_49 {dimension_numbers = #tpu.dot_dimension_numbers<[1], [0], [0], [1], [0, 0, 1, 1], [], []>} : vector<8x4xbf16>, vector<4x256xbf16>, vector<8x256xf32> -> vector<8x256xf32>
    %74 = arith.addf %63, %73 : vector<8x256xf32>
    %cst_50 = arith.constant 0.000000e+00 : bf16
    %75 = vector.broadcast %cst_50 : bf16 to vector<4x16xbf16>
    %76 = vector.extract_strided_slice %1 {offsets = [0, 16], sizes = [4, 240], strides = [1, 1]} : vector<4x256xbf16> to vector<4x240xbf16>
    %77 = tpu.concatenate %76, %75 in 1 : vector<4x240xbf16>, vector<4x16xbf16> -> vector<4x256xbf16>
    %c7 = arith.constant 7 : index
    %c0_51 = arith.constant 0 : index
    %c0_52 = arith.constant 0 : index
    %78 = vector.load %arg2[%c7, %c0_51, %c0_52] : memref<9x1x256xbf16, #tpu.memory_space<vmem>>, vector<1x1x256xbf16>
    %79 = vector.shape_cast %78 : vector<1x1x256xbf16> to vector<1x256xbf16>
    %80 = vector.broadcast %79 : vector<1x256xbf16> to vector<4x256xbf16>
    %81 = arith.mulf %77, %80 : vector<4x256xbf16>
    %c7_53 = arith.constant 7 : index
    %c0_54 = arith.constant 0 : index
    %c0_55 = arith.constant 0 : index
    %82 = vector.load %arg4[%c7_53, %c0_54, %c0_55] : memref<9x8x4xbf16, #tpu.memory_space<vmem>>, vector<1x8x4xbf16>
    %83 = vector.shape_cast %82 : vector<1x8x4xbf16> to vector<8x4xbf16>
    %cst_56 = arith.constant dense<0.000000e+00> : vector<8x256xf32>
    %84 = tpu.matmul %83, %81, %cst_56 {dimension_numbers = #tpu.dot_dimension_numbers<[1], [0], [0], [1], [0, 0, 1, 1], [], []>} : vector<8x4xbf16>, vector<4x256xbf16>, vector<8x256xf32> -> vector<8x256xf32>
    %85 = arith.addf %74, %84 : vector<8x256xf32>
    %cst_57 = arith.constant 0.000000e+00 : bf16
    %86 = vector.broadcast %cst_57 : bf16 to vector<4x17xbf16>
    %87 = vector.extract_strided_slice %1 {offsets = [0, 17], sizes = [4, 239], strides = [1, 1]} : vector<4x256xbf16> to vector<4x239xbf16>
    %88 = tpu.concatenate %87, %86 in 1 : vector<4x239xbf16>, vector<4x17xbf16> -> vector<4x256xbf16>
    %c8 = arith.constant 8 : index
    %c0_58 = arith.constant 0 : index
    %c0_59 = arith.constant 0 : index
    %89 = vector.load %arg2[%c8, %c0_58, %c0_59] : memref<9x1x256xbf16, #tpu.memory_space<vmem>>, vector<1x1x256xbf16>
    %90 = vector.shape_cast %89 : vector<1x1x256xbf16> to vector<1x256xbf16>
    %91 = vector.broadcast %90 : vector<1x256xbf16> to vector<4x256xbf16>
    %92 = arith.mulf %88, %91 : vector<4x256xbf16>
    %c8_60 = arith.constant 8 : index
    %c0_61 = arith.constant 0 : index
    %c0_62 = arith.constant 0 : index
    %93 = vector.load %arg4[%c8_60, %c0_61, %c0_62] : memref<9x8x4xbf16, #tpu.memory_space<vmem>>, vector<1x8x4xbf16>
    %94 = vector.shape_cast %93 : vector<1x8x4xbf16> to vector<8x4xbf16>
    %cst_63 = arith.constant dense<0.000000e+00> : vector<8x256xf32>
    %95 = tpu.matmul %94, %92, %cst_63 {dimension_numbers = #tpu.dot_dimension_numbers<[1], [0], [0], [1], [0, 0, 1, 1], [], []>} : vector<8x4xbf16>, vector<4x256xbf16>, vector<8x256xf32> -> vector<8x256xf32>
    %96 = arith.addf %85, %95 : vector<8x256xf32>
    %c0_64 = arith.constant 0 : index
    %c0_65 = arith.constant 0 : index
    %97 = vector.load %arg5[%c0_64, %c0_65] : memref<8x1xf32, #tpu.memory_space<vmem>>, vector<8x1xf32>
    %98 = vector.broadcast %97 : vector<8x1xf32> to vector<8x256xf32>
    %99 = arith.addf %96, %98 : vector<8x256xf32>
    %cst_66 = arith.constant 0.000000e+00 : f32
    %100 = vector.broadcast %cst_66 : f32 to vector<8x256xf32>
    %101 = arith.maximumf %99, %100 : vector<8x256xf32>
    %102 = arith.truncf %101 : vector<8x256xf32> to vector<8x256xbf16>
    %c0_67 = arith.constant 0 : index
    %c0_68 = arith.constant 0 : index
    %103 = vector.load %arg8[%c0_67, %c0_68] : memref<8x4xbf16, #tpu.memory_space<vmem>>, vector<8x4xbf16>
    %cst_69 = arith.constant dense<0.000000e+00> : vector<8x256xf32>
    %104 = tpu.matmul %103, %1, %cst_69 {dimension_numbers = #tpu.dot_dimension_numbers<[1], [0], [0], [1], [0, 0, 1, 1], [], []>} : vector<8x4xbf16>, vector<4x256xbf16>, vector<8x256xf32> -> vector<8x256xf32>
    %c0_70 = arith.constant 0 : index
    %c0_71 = arith.constant 0 : index
    %105 = vector.load %arg9[%c0_70, %c0_71] : memref<8x1xf32, #tpu.memory_space<vmem>>, vector<8x1xf32>
    %106 = vector.broadcast %105 : vector<8x1xf32> to vector<8x256xf32>
    %107 = arith.addf %104, %106 : vector<8x256xf32>
    %cst_72 = arith.constant 0.000000e+00 : bf16
    %108 = vector.broadcast %cst_72 : bf16 to vector<8x17xbf16>
    %109 = vector.extract_strided_slice %102 {offsets = [0, 0], sizes = [8, 239], strides = [1, 1]} : vector<8x256xbf16> to vector<8x239xbf16>
    %110 = tpu.concatenate %108, %109 in 1 : vector<8x17xbf16>, vector<8x239xbf16> -> vector<8x256xbf16>
    %c0_73 = arith.constant 0 : index
    %c0_74 = arith.constant 0 : index
    %c0_75 = arith.constant 0 : index
    %111 = vector.load %arg3[%c0_73, %c0_74, %c0_75] : memref<9x1x256xbf16, #tpu.memory_space<vmem>>, vector<1x1x256xbf16>
    %112 = vector.shape_cast %111 : vector<1x1x256xbf16> to vector<1x256xbf16>
    %113 = vector.broadcast %112 : vector<1x256xbf16> to vector<8x256xbf16>
    %114 = arith.mulf %110, %113 : vector<8x256xbf16>
    %c0_76 = arith.constant 0 : index
    %c0_77 = arith.constant 0 : index
    %c0_78 = arith.constant 0 : index
    %115 = vector.load %arg6[%c0_76, %c0_77, %c0_78] : memref<9x8x8xbf16, #tpu.memory_space<vmem>>, vector<1x8x8xbf16>
    %116 = vector.shape_cast %115 : vector<1x8x8xbf16> to vector<8x8xbf16>
    %cst_79 = arith.constant dense<0.000000e+00> : vector<8x256xf32>
    %117 = tpu.matmul %116, %114, %cst_79 {dimension_numbers = #tpu.dot_dimension_numbers<[1], [0], [0], [1], [0, 0, 1, 1], [], []>} : vector<8x8xbf16>, vector<8x256xbf16>, vector<8x256xf32> -> vector<8x256xf32>
    %cst_80 = arith.constant 0.000000e+00 : bf16
    %118 = vector.broadcast %cst_80 : bf16 to vector<8x16xbf16>
    %119 = vector.extract_strided_slice %102 {offsets = [0, 0], sizes = [8, 240], strides = [1, 1]} : vector<8x256xbf16> to vector<8x240xbf16>
    %120 = tpu.concatenate %118, %119 in 1 : vector<8x16xbf16>, vector<8x240xbf16> -> vector<8x256xbf16>
    %c1_81 = arith.constant 1 : index
    %c0_82 = arith.constant 0 : index
    %c0_83 = arith.constant 0 : index
    %121 = vector.load %arg3[%c1_81, %c0_82, %c0_83] : memref<9x1x256xbf16, #tpu.memory_space<vmem>>, vector<1x1x256xbf16>
    %122 = vector.shape_cast %121 : vector<1x1x256xbf16> to vector<1x256xbf16>
    %123 = vector.broadcast %122 : vector<1x256xbf16> to vector<8x256xbf16>
    %124 = arith.mulf %120, %123 : vector<8x256xbf16>
    %c1_84 = arith.constant 1 : index
    %c0_85 = arith.constant 0 : index
    %c0_86 = arith.constant 0 : index
    %125 = vector.load %arg6[%c1_84, %c0_85, %c0_86] : memref<9x8x8xbf16, #tpu.memory_space<vmem>>, vector<1x8x8xbf16>
    %126 = vector.shape_cast %125 : vector<1x8x8xbf16> to vector<8x8xbf16>
    %cst_87 = arith.constant dense<0.000000e+00> : vector<8x256xf32>
    %127 = tpu.matmul %126, %124, %cst_87 {dimension_numbers = #tpu.dot_dimension_numbers<[1], [0], [0], [1], [0, 0, 1, 1], [], []>} : vector<8x8xbf16>, vector<8x256xbf16>, vector<8x256xf32> -> vector<8x256xf32>
    %128 = arith.addf %117, %127 : vector<8x256xf32>
    %cst_88 = arith.constant 0.000000e+00 : bf16
    %129 = vector.broadcast %cst_88 : bf16 to vector<8x15xbf16>
    %130 = vector.extract_strided_slice %102 {offsets = [0, 0], sizes = [8, 241], strides = [1, 1]} : vector<8x256xbf16> to vector<8x241xbf16>
    %131 = tpu.concatenate %129, %130 in 1 : vector<8x15xbf16>, vector<8x241xbf16> -> vector<8x256xbf16>
    %c2_89 = arith.constant 2 : index
    %c0_90 = arith.constant 0 : index
    %c0_91 = arith.constant 0 : index
    %132 = vector.load %arg3[%c2_89, %c0_90, %c0_91] : memref<9x1x256xbf16, #tpu.memory_space<vmem>>, vector<1x1x256xbf16>
    %133 = vector.shape_cast %132 : vector<1x1x256xbf16> to vector<1x256xbf16>
    %134 = vector.broadcast %133 : vector<1x256xbf16> to vector<8x256xbf16>
    %135 = arith.mulf %131, %134 : vector<8x256xbf16>
    %c2_92 = arith.constant 2 : index
    %c0_93 = arith.constant 0 : index
    %c0_94 = arith.constant 0 : index
    %136 = vector.load %arg6[%c2_92, %c0_93, %c0_94] : memref<9x8x8xbf16, #tpu.memory_space<vmem>>, vector<1x8x8xbf16>
    %137 = vector.shape_cast %136 : vector<1x8x8xbf16> to vector<8x8xbf16>
    %cst_95 = arith.constant dense<0.000000e+00> : vector<8x256xf32>
    %138 = tpu.matmul %137, %135, %cst_95 {dimension_numbers = #tpu.dot_dimension_numbers<[1], [0], [0], [1], [0, 0, 1, 1], [], []>} : vector<8x8xbf16>, vector<8x256xbf16>, vector<8x256xf32> -> vector<8x256xf32>
    %139 = arith.addf %128, %138 : vector<8x256xf32>
    %cst_96 = arith.constant 0.000000e+00 : bf16
    %140 = vector.broadcast %cst_96 : bf16 to vector<8x1xbf16>
    %141 = vector.extract_strided_slice %102 {offsets = [0, 0], sizes = [8, 255], strides = [1, 1]} : vector<8x256xbf16> to vector<8x255xbf16>
    %142 = tpu.concatenate %140, %141 in 1 : vector<8x1xbf16>, vector<8x255xbf16> -> vector<8x256xbf16>
    %c3_97 = arith.constant 3 : index
    %c0_98 = arith.constant 0 : index
    %c0_99 = arith.constant 0 : index
    %143 = vector.load %arg3[%c3_97, %c0_98, %c0_99] : memref<9x1x256xbf16, #tpu.memory_space<vmem>>, vector<1x1x256xbf16>
    %144 = vector.shape_cast %143 : vector<1x1x256xbf16> to vector<1x256xbf16>
    %145 = vector.broadcast %144 : vector<1x256xbf16> to vector<8x256xbf16>
    %146 = arith.mulf %142, %145 : vector<8x256xbf16>
    %c3_100 = arith.constant 3 : index
    %c0_101 = arith.constant 0 : index
    %c0_102 = arith.constant 0 : index
    %147 = vector.load %arg6[%c3_100, %c0_101, %c0_102] : memref<9x8x8xbf16, #tpu.memory_space<vmem>>, vector<1x8x8xbf16>
    %148 = vector.shape_cast %147 : vector<1x8x8xbf16> to vector<8x8xbf16>
    %cst_103 = arith.constant dense<0.000000e+00> : vector<8x256xf32>
    %149 = tpu.matmul %148, %146, %cst_103 {dimension_numbers = #tpu.dot_dimension_numbers<[1], [0], [0], [1], [0, 0, 1, 1], [], []>} : vector<8x8xbf16>, vector<8x256xbf16>, vector<8x256xf32> -> vector<8x256xf32>
    %150 = arith.addf %139, %149 : vector<8x256xf32>
    %c4_104 = arith.constant 4 : index
    %c0_105 = arith.constant 0 : index
    %c0_106 = arith.constant 0 : index
    %151 = vector.load %arg3[%c4_104, %c0_105, %c0_106] : memref<9x1x256xbf16, #tpu.memory_space<vmem>>, vector<1x1x256xbf16>
    %152 = vector.shape_cast %151 : vector<1x1x256xbf16> to vector<1x256xbf16>
    %153 = vector.broadcast %152 : vector<1x256xbf16> to vector<8x256xbf16>
    %154 = arith.mulf %102, %153 : vector<8x256xbf16>
    %c4_107 = arith.constant 4 : index
    %c0_108 = arith.constant 0 : index
    %c0_109 = arith.constant 0 : index
    %155 = vector.load %arg6[%c4_107, %c0_108, %c0_109] : memref<9x8x8xbf16, #tpu.memory_space<vmem>>, vector<1x8x8xbf16>
    %156 = vector.shape_cast %155 : vector<1x8x8xbf16> to vector<8x8xbf16>
    %cst_110 = arith.constant dense<0.000000e+00> : vector<8x256xf32>
    %157 = tpu.matmul %156, %154, %cst_110 {dimension_numbers = #tpu.dot_dimension_numbers<[1], [0], [0], [1], [0, 0, 1, 1], [], []>} : vector<8x8xbf16>, vector<8x256xbf16>, vector<8x256xf32> -> vector<8x256xf32>
    %158 = arith.addf %150, %157 : vector<8x256xf32>
    %cst_111 = arith.constant 0.000000e+00 : bf16
    %159 = vector.broadcast %cst_111 : bf16 to vector<8x1xbf16>
    %160 = vector.extract_strided_slice %102 {offsets = [0, 1], sizes = [8, 255], strides = [1, 1]} : vector<8x256xbf16> to vector<8x255xbf16>
    %161 = tpu.concatenate %160, %159 in 1 : vector<8x255xbf16>, vector<8x1xbf16> -> vector<8x256xbf16>
    %c5_112 = arith.constant 5 : index
    %c0_113 = arith.constant 0 : index
    %c0_114 = arith.constant 0 : index
    %162 = vector.load %arg3[%c5_112, %c0_113, %c0_114] : memref<9x1x256xbf16, #tpu.memory_space<vmem>>, vector<1x1x256xbf16>
    %163 = vector.shape_cast %162 : vector<1x1x256xbf16> to vector<1x256xbf16>
    %164 = vector.broadcast %163 : vector<1x256xbf16> to vector<8x256xbf16>
    %165 = arith.mulf %161, %164 : vector<8x256xbf16>
    %c5_115 = arith.constant 5 : index
    %c0_116 = arith.constant 0 : index
    %c0_117 = arith.constant 0 : index
    %166 = vector.load %arg6[%c5_115, %c0_116, %c0_117] : memref<9x8x8xbf16, #tpu.memory_space<vmem>>, vector<1x8x8xbf16>
    %167 = vector.shape_cast %166 : vector<1x8x8xbf16> to vector<8x8xbf16>
    %cst_118 = arith.constant dense<0.000000e+00> : vector<8x256xf32>
    %168 = tpu.matmul %167, %165, %cst_118 {dimension_numbers = #tpu.dot_dimension_numbers<[1], [0], [0], [1], [0, 0, 1, 1], [], []>} : vector<8x8xbf16>, vector<8x256xbf16>, vector<8x256xf32> -> vector<8x256xf32>
    %169 = arith.addf %158, %168 : vector<8x256xf32>
    %cst_119 = arith.constant 0.000000e+00 : bf16
    %170 = vector.broadcast %cst_119 : bf16 to vector<8x15xbf16>
    %171 = vector.extract_strided_slice %102 {offsets = [0, 15], sizes = [8, 241], strides = [1, 1]} : vector<8x256xbf16> to vector<8x241xbf16>
    %172 = tpu.concatenate %171, %170 in 1 : vector<8x241xbf16>, vector<8x15xbf16> -> vector<8x256xbf16>
    %c6_120 = arith.constant 6 : index
    %c0_121 = arith.constant 0 : index
    %c0_122 = arith.constant 0 : index
    %173 = vector.load %arg3[%c6_120, %c0_121, %c0_122] : memref<9x1x256xbf16, #tpu.memory_space<vmem>>, vector<1x1x256xbf16>
    %174 = vector.shape_cast %173 : vector<1x1x256xbf16> to vector<1x256xbf16>
    %175 = vector.broadcast %174 : vector<1x256xbf16> to vector<8x256xbf16>
    %176 = arith.mulf %172, %175 : vector<8x256xbf16>
    %c6_123 = arith.constant 6 : index
    %c0_124 = arith.constant 0 : index
    %c0_125 = arith.constant 0 : index
    %177 = vector.load %arg6[%c6_123, %c0_124, %c0_125] : memref<9x8x8xbf16, #tpu.memory_space<vmem>>, vector<1x8x8xbf16>
    %178 = vector.shape_cast %177 : vector<1x8x8xbf16> to vector<8x8xbf16>
    %cst_126 = arith.constant dense<0.000000e+00> : vector<8x256xf32>
    %179 = tpu.matmul %178, %176, %cst_126 {dimension_numbers = #tpu.dot_dimension_numbers<[1], [0], [0], [1], [0, 0, 1, 1], [], []>} : vector<8x8xbf16>, vector<8x256xbf16>, vector<8x256xf32> -> vector<8x256xf32>
    %180 = arith.addf %169, %179 : vector<8x256xf32>
    %cst_127 = arith.constant 0.000000e+00 : bf16
    %181 = vector.broadcast %cst_127 : bf16 to vector<8x16xbf16>
    %182 = vector.extract_strided_slice %102 {offsets = [0, 16], sizes = [8, 240], strides = [1, 1]} : vector<8x256xbf16> to vector<8x240xbf16>
    %183 = tpu.concatenate %182, %181 in 1 : vector<8x240xbf16>, vector<8x16xbf16> -> vector<8x256xbf16>
    %c7_128 = arith.constant 7 : index
    %c0_129 = arith.constant 0 : index
    %c0_130 = arith.constant 0 : index
    %184 = vector.load %arg3[%c7_128, %c0_129, %c0_130] : memref<9x1x256xbf16, #tpu.memory_space<vmem>>, vector<1x1x256xbf16>
    %185 = vector.shape_cast %184 : vector<1x1x256xbf16> to vector<1x256xbf16>
    %186 = vector.broadcast %185 : vector<1x256xbf16> to vector<8x256xbf16>
    %187 = arith.mulf %183, %186 : vector<8x256xbf16>
    %c7_131 = arith.constant 7 : index
    %c0_132 = arith.constant 0 : index
    %c0_133 = arith.constant 0 : index
    %188 = vector.load %arg6[%c7_131, %c0_132, %c0_133] : memref<9x8x8xbf16, #tpu.memory_space<vmem>>, vector<1x8x8xbf16>
    %189 = vector.shape_cast %188 : vector<1x8x8xbf16> to vector<8x8xbf16>
    %cst_134 = arith.constant dense<0.000000e+00> : vector<8x256xf32>
    %190 = tpu.matmul %189, %187, %cst_134 {dimension_numbers = #tpu.dot_dimension_numbers<[1], [0], [0], [1], [0, 0, 1, 1], [], []>} : vector<8x8xbf16>, vector<8x256xbf16>, vector<8x256xf32> -> vector<8x256xf32>
    %191 = arith.addf %180, %190 : vector<8x256xf32>
    %cst_135 = arith.constant 0.000000e+00 : bf16
    %192 = vector.broadcast %cst_135 : bf16 to vector<8x17xbf16>
    %193 = vector.extract_strided_slice %102 {offsets = [0, 17], sizes = [8, 239], strides = [1, 1]} : vector<8x256xbf16> to vector<8x239xbf16>
    %194 = tpu.concatenate %193, %192 in 1 : vector<8x239xbf16>, vector<8x17xbf16> -> vector<8x256xbf16>
    %c8_136 = arith.constant 8 : index
    %c0_137 = arith.constant 0 : index
    %c0_138 = arith.constant 0 : index
    %195 = vector.load %arg3[%c8_136, %c0_137, %c0_138] : memref<9x1x256xbf16, #tpu.memory_space<vmem>>, vector<1x1x256xbf16>
    %196 = vector.shape_cast %195 : vector<1x1x256xbf16> to vector<1x256xbf16>
    %197 = vector.broadcast %196 : vector<1x256xbf16> to vector<8x256xbf16>
    %198 = arith.mulf %194, %197 : vector<8x256xbf16>
    %c8_139 = arith.constant 8 : index
    %c0_140 = arith.constant 0 : index
    %c0_141 = arith.constant 0 : index
    %199 = vector.load %arg6[%c8_139, %c0_140, %c0_141] : memref<9x8x8xbf16, #tpu.memory_space<vmem>>, vector<1x8x8xbf16>
    %200 = vector.shape_cast %199 : vector<1x8x8xbf16> to vector<8x8xbf16>
    %cst_142 = arith.constant dense<0.000000e+00> : vector<8x256xf32>
    %201 = tpu.matmul %200, %198, %cst_142 {dimension_numbers = #tpu.dot_dimension_numbers<[1], [0], [0], [1], [0, 0, 1, 1], [], []>} : vector<8x8xbf16>, vector<8x256xbf16>, vector<8x256xf32> -> vector<8x256xf32>
    %202 = arith.addf %191, %201 : vector<8x256xf32>
    %c0_143 = arith.constant 0 : index
    %c0_144 = arith.constant 0 : index
    %203 = vector.load %arg7[%c0_143, %c0_144] : memref<8x1xf32, #tpu.memory_space<vmem>>, vector<8x1xf32>
    %204 = vector.broadcast %203 : vector<8x1xf32> to vector<8x256xf32>
    %205 = arith.addf %202, %204 : vector<8x256xf32>
    %206 = arith.addf %205, %107 : vector<8x256xf32>
    %cst_145 = arith.constant 0.000000e+00 : f32
    %207 = vector.broadcast %cst_145 : f32 to vector<8x256xf32>
    %208 = arith.maximumf %206, %207 : vector<8x256xf32>
    %c0_146 = arith.constant 0 : index
    %c0_147 = arith.constant 0 : index
    %c0_148 = arith.constant 0 : index
    %209 = vector.load %arg10[%c0_146, %c0_147, %c0_148] : memref<2x8x256xf32, #tpu.memory_space<vmem>>, vector<1x8x256xf32>
    %210 = vector.shape_cast %209 : vector<1x8x256xf32> to vector<8x256xf32>
    %211 = vector.shape_cast %208 : vector<8x256xf32> to vector<1x8x256xf32>
    tpu.vector_store %arg10[%c0_146, %c0_147, %c0_148], %211 {strides = array<i32>} : memref<2x8x256xf32, #tpu.memory_space<vmem>>, vector<1x8x256xf32>,
    %c1_149 = arith.constant 1 : index
    %c0_150 = arith.constant 0 : index
    %c0_151 = arith.constant 0 : index
    %212 = vector.load %arg1[%c1_149, %c0_150, %c0_151] : memref<2x4x256xbf16, #tpu.memory_space<vmem>>, vector<1x4x256xbf16>
    %213 = vector.shape_cast %212 : vector<1x4x256xbf16> to vector<4x256xbf16>
    %cst_152 = arith.constant 0.000000e+00 : bf16
    %214 = vector.broadcast %cst_152 : bf16 to vector<4x17xbf16>
    %215 = vector.extract_strided_slice %213 {offsets = [0, 0], sizes = [4, 239], strides = [1, 1]} : vector<4x256xbf16> to vector<4x239xbf16>
    %216 = tpu.concatenate %214, %215 in 1 : vector<4x17xbf16>, vector<4x239xbf16> -> vector<4x256xbf16>
    %c0_153 = arith.constant 0 : index
    %c0_154 = arith.constant 0 : index
    %c0_155 = arith.constant 0 : index
    %217 = vector.load %arg2[%c0_153, %c0_154, %c0_155] : memref<9x1x256xbf16, #tpu.memory_space<vmem>>, vector<1x1x256xbf16>
    %218 = vector.shape_cast %217 : vector<1x1x256xbf16> to vector<1x256xbf16>
    %219 = vector.broadcast %218 : vector<1x256xbf16> to vector<4x256xbf16>
    %220 = arith.mulf %216, %219 : vector<4x256xbf16>
    %c0_156 = arith.constant 0 : index
    %c0_157 = arith.constant 0 : index
    %c0_158 = arith.constant 0 : index
    %221 = vector.load %arg4[%c0_156, %c0_157, %c0_158] : memref<9x8x4xbf16, #tpu.memory_space<vmem>>, vector<1x8x4xbf16>
    %222 = vector.shape_cast %221 : vector<1x8x4xbf16> to vector<8x4xbf16>
    %cst_159 = arith.constant dense<0.000000e+00> : vector<8x256xf32>
    %223 = tpu.matmul %222, %220, %cst_159 {dimension_numbers = #tpu.dot_dimension_numbers<[1], [0], [0], [1], [0, 0, 1, 1], [], []>} : vector<8x4xbf16>, vector<4x256xbf16>, vector<8x256xf32> -> vector<8x256xf32>
    %cst_160 = arith.constant 0.000000e+00 : bf16
    %224 = vector.broadcast %cst_160 : bf16 to vector<4x16xbf16>
    %225 = vector.extract_strided_slice %213 {offsets = [0, 0], sizes = [4, 240], strides = [1, 1]} : vector<4x256xbf16> to vector<4x240xbf16>
    %226 = tpu.concatenate %224, %225 in 1 : vector<4x16xbf16>, vector<4x240xbf16> -> vector<4x256xbf16>
    %c1_161 = arith.constant 1 : index
    %c0_162 = arith.constant 0 : index
    %c0_163 = arith.constant 0 : index
    %227 = vector.load %arg2[%c1_161, %c0_162, %c0_163] : memref<9x1x256xbf16, #tpu.memory_space<vmem>>, vector<1x1x256xbf16>
    %228 = vector.shape_cast %227 : vector<1x1x256xbf16> to vector<1x256xbf16>
    %229 = vector.broadcast %228 : vector<1x256xbf16> to vector<4x256xbf16>
    %230 = arith.mulf %226, %229 : vector<4x256xbf16>
    %c1_164 = arith.constant 1 : index
    %c0_165 = arith.constant 0 : index
    %c0_166 = arith.constant 0 : index
    %231 = vector.load %arg4[%c1_164, %c0_165, %c0_166] : memref<9x8x4xbf16, #tpu.memory_space<vmem>>, vector<1x8x4xbf16>
    %232 = vector.shape_cast %231 : vector<1x8x4xbf16> to vector<8x4xbf16>
    %cst_167 = arith.constant dense<0.000000e+00> : vector<8x256xf32>
    %233 = tpu.matmul %232, %230, %cst_167 {dimension_numbers = #tpu.dot_dimension_numbers<[1], [0], [0], [1], [0, 0, 1, 1], [], []>} : vector<8x4xbf16>, vector<4x256xbf16>, vector<8x256xf32> -> vector<8x256xf32>
    %234 = arith.addf %223, %233 : vector<8x256xf32>
    %cst_168 = arith.constant 0.000000e+00 : bf16
    %235 = vector.broadcast %cst_168 : bf16 to vector<4x15xbf16>
    %236 = vector.extract_strided_slice %213 {offsets = [0, 0], sizes = [4, 241], strides = [1, 1]} : vector<4x256xbf16> to vector<4x241xbf16>
    %237 = tpu.concatenate %235, %236 in 1 : vector<4x15xbf16>, vector<4x241xbf16> -> vector<4x256xbf16>
    %c2_169 = arith.constant 2 : index
    %c0_170 = arith.constant 0 : index
    %c0_171 = arith.constant 0 : index
    %238 = vector.load %arg2[%c2_169, %c0_170, %c0_171] : memref<9x1x256xbf16, #tpu.memory_space<vmem>>, vector<1x1x256xbf16>
    %239 = vector.shape_cast %238 : vector<1x1x256xbf16> to vector<1x256xbf16>
    %240 = vector.broadcast %239 : vector<1x256xbf16> to vector<4x256xbf16>
    %241 = arith.mulf %237, %240 : vector<4x256xbf16>
    %c2_172 = arith.constant 2 : index
    %c0_173 = arith.constant 0 : index
    %c0_174 = arith.constant 0 : index
    %242 = vector.load %arg4[%c2_172, %c0_173, %c0_174] : memref<9x8x4xbf16, #tpu.memory_space<vmem>>, vector<1x8x4xbf16>
    %243 = vector.shape_cast %242 : vector<1x8x4xbf16> to vector<8x4xbf16>
    %cst_175 = arith.constant dense<0.000000e+00> : vector<8x256xf32>
    %244 = tpu.matmul %243, %241, %cst_175 {dimension_numbers = #tpu.dot_dimension_numbers<[1], [0], [0], [1], [0, 0, 1, 1], [], []>} : vector<8x4xbf16>, vector<4x256xbf16>, vector<8x256xf32> -> vector<8x256xf32>
    %245 = arith.addf %234, %244 : vector<8x256xf32>
    %cst_176 = arith.constant 0.000000e+00 : bf16
    %246 = vector.broadcast %cst_176 : bf16 to vector<4x1xbf16>
    %247 = vector.extract_strided_slice %213 {offsets = [0, 0], sizes = [4, 255], strides = [1, 1]} : vector<4x256xbf16> to vector<4x255xbf16>
    %248 = tpu.concatenate %246, %247 in 1 : vector<4x1xbf16>, vector<4x255xbf16> -> vector<4x256xbf16>
    %c3_177 = arith.constant 3 : index
    %c0_178 = arith.constant 0 : index
    %c0_179 = arith.constant 0 : index
    %249 = vector.load %arg2[%c3_177, %c0_178, %c0_179] : memref<9x1x256xbf16, #tpu.memory_space<vmem>>, vector<1x1x256xbf16>
    %250 = vector.shape_cast %249 : vector<1x1x256xbf16> to vector<1x256xbf16>
    %251 = vector.broadcast %250 : vector<1x256xbf16> to vector<4x256xbf16>
    %252 = arith.mulf %248, %251 : vector<4x256xbf16>
    %c3_180 = arith.constant 3 : index
    %c0_181 = arith.constant 0 : index
    %c0_182 = arith.constant 0 : index
    %253 = vector.load %arg4[%c3_180, %c0_181, %c0_182] : memref<9x8x4xbf16, #tpu.memory_space<vmem>>, vector<1x8x4xbf16>
    %254 = vector.shape_cast %253 : vector<1x8x4xbf16> to vector<8x4xbf16>
    %cst_183 = arith.constant dense<0.000000e+00> : vector<8x256xf32>
    %255 = tpu.matmul %254, %252, %cst_183 {dimension_numbers = #tpu.dot_dimension_numbers<[1], [0], [0], [1], [0, 0, 1, 1], [], []>} : vector<8x4xbf16>, vector<4x256xbf16>, vector<8x256xf32> -> vector<8x256xf32>
    %256 = arith.addf %245, %255 : vector<8x256xf32>
    %c4_184 = arith.constant 4 : index
    %c0_185 = arith.constant 0 : index
    %c0_186 = arith.constant 0 : index
    %257 = vector.load %arg2[%c4_184, %c0_185, %c0_186] : memref<9x1x256xbf16, #tpu.memory_space<vmem>>, vector<1x1x256xbf16>
    %258 = vector.shape_cast %257 : vector<1x1x256xbf16> to vector<1x256xbf16>
    %259 = vector.broadcast %258 : vector<1x256xbf16> to vector<4x256xbf16>
    %260 = arith.mulf %213, %259 : vector<4x256xbf16>
    %c4_187 = arith.constant 4 : index
    %c0_188 = arith.constant 0 : index
    %c0_189 = arith.constant 0 : index
    %261 = vector.load %arg4[%c4_187, %c0_188, %c0_189] : memref<9x8x4xbf16, #tpu.memory_space<vmem>>, vector<1x8x4xbf16>
    %262 = vector.shape_cast %261 : vector<1x8x4xbf16> to vector<8x4xbf16>
    %cst_190 = arith.constant dense<0.000000e+00> : vector<8x256xf32>
    %263 = tpu.matmul %262, %260, %cst_190 {dimension_numbers = #tpu.dot_dimension_numbers<[1], [0], [0], [1], [0, 0, 1, 1], [], []>} : vector<8x4xbf16>, vector<4x256xbf16>, vector<8x256xf32> -> vector<8x256xf32>
    %264 = arith.addf %256, %263 : vector<8x256xf32>
    %cst_191 = arith.constant 0.000000e+00 : bf16
    %265 = vector.broadcast %cst_191 : bf16 to vector<4x1xbf16>
    %266 = vector.extract_strided_slice %213 {offsets = [0, 1], sizes = [4, 255], strides = [1, 1]} : vector<4x256xbf16> to vector<4x255xbf16>
    %267 = tpu.concatenate %266, %265 in 1 : vector<4x255xbf16>, vector<4x1xbf16> -> vector<4x256xbf16>
    %c5_192 = arith.constant 5 : index
    %c0_193 = arith.constant 0 : index
    %c0_194 = arith.constant 0 : index
    %268 = vector.load %arg2[%c5_192, %c0_193, %c0_194] : memref<9x1x256xbf16, #tpu.memory_space<vmem>>, vector<1x1x256xbf16>
    %269 = vector.shape_cast %268 : vector<1x1x256xbf16> to vector<1x256xbf16>
    %270 = vector.broadcast %269 : vector<1x256xbf16> to vector<4x256xbf16>
    %271 = arith.mulf %267, %270 : vector<4x256xbf16>
    %c5_195 = arith.constant 5 : index
    %c0_196 = arith.constant 0 : index
    %c0_197 = arith.constant 0 : index
    %272 = vector.load %arg4[%c5_195, %c0_196, %c0_197] : memref<9x8x4xbf16, #tpu.memory_space<vmem>>, vector<1x8x4xbf16>
    %273 = vector.shape_cast %272 : vector<1x8x4xbf16> to vector<8x4xbf16>
    %cst_198 = arith.constant dense<0.000000e+00> : vector<8x256xf32>
    %274 = tpu.matmul %273, %271, %cst_198 {dimension_numbers = #tpu.dot_dimension_numbers<[1], [0], [0], [1], [0, 0, 1, 1], [], []>} : vector<8x4xbf16>, vector<4x256xbf16>, vector<8x256xf32> -> vector<8x256xf32>
    %275 = arith.addf %264, %274 : vector<8x256xf32>
    %cst_199 = arith.constant 0.000000e+00 : bf16
    %276 = vector.broadcast %cst_199 : bf16 to vector<4x15xbf16>
    %277 = vector.extract_strided_slice %213 {offsets = [0, 15], sizes = [4, 241], strides = [1, 1]} : vector<4x256xbf16> to vector<4x241xbf16>
    %278 = tpu.concatenate %277, %276 in 1 : vector<4x241xbf16>, vector<4x15xbf16> -> vector<4x256xbf16>
    %c6_200 = arith.constant 6 : index
    %c0_201 = arith.constant 0 : index
    %c0_202 = arith.constant 0 : index
    %279 = vector.load %arg2[%c6_200, %c0_201, %c0_202] : memref<9x1x256xbf16, #tpu.memory_space<vmem>>, vector<1x1x256xbf16>
    %280 = vector.shape_cast %279 : vector<1x1x256xbf16> to vector<1x256xbf16>
    %281 = vector.broadcast %280 : vector<1x256xbf16> to vector<4x256xbf16>
    %282 = arith.mulf %278, %281 : vector<4x256xbf16>
    %c6_203 = arith.constant 6 : index
    %c0_204 = arith.constant 0 : index
    %c0_205 = arith.constant 0 : index
    %283 = vector.load %arg4[%c6_203, %c0_204, %c0_205] : memref<9x8x4xbf16, #tpu.memory_space<vmem>>, vector<1x8x4xbf16>
    %284 = vector.shape_cast %283 : vector<1x8x4xbf16> to vector<8x4xbf16>
    %cst_206 = arith.constant dense<0.000000e+00> : vector<8x256xf32>
    %285 = tpu.matmul %284, %282, %cst_206 {dimension_numbers = #tpu.dot_dimension_numbers<[1], [0], [0], [1], [0, 0, 1, 1], [], []>} : vector<8x4xbf16>, vector<4x256xbf16>, vector<8x256xf32> -> vector<8x256xf32>
    %286 = arith.addf %275, %285 : vector<8x256xf32>
    %cst_207 = arith.constant 0.000000e+00 : bf16
    %287 = vector.broadcast %cst_207 : bf16 to vector<4x16xbf16>
    %288 = vector.extract_strided_slice %213 {offsets = [0, 16], sizes = [4, 240], strides = [1, 1]} : vector<4x256xbf16> to vector<4x240xbf16>
    %289 = tpu.concatenate %288, %287 in 1 : vector<4x240xbf16>, vector<4x16xbf16> -> vector<4x256xbf16>
    %c7_208 = arith.constant 7 : index
    %c0_209 = arith.constant 0 : index
    %c0_210 = arith.constant 0 : index
    %290 = vector.load %arg2[%c7_208, %c0_209, %c0_210] : memref<9x1x256xbf16, #tpu.memory_space<vmem>>, vector<1x1x256xbf16>
    %291 = vector.shape_cast %290 : vector<1x1x256xbf16> to vector<1x256xbf16>
    %292 = vector.broadcast %291 : vector<1x256xbf16> to vector<4x256xbf16>
    %293 = arith.mulf %289, %292 : vector<4x256xbf16>
    %c7_211 = arith.constant 7 : index
    %c0_212 = arith.constant 0 : index
    %c0_213 = arith.constant 0 : index
    %294 = vector.load %arg4[%c7_211, %c0_212, %c0_213] : memref<9x8x4xbf16, #tpu.memory_space<vmem>>, vector<1x8x4xbf16>
    %295 = vector.shape_cast %294 : vector<1x8x4xbf16> to vector<8x4xbf16>
    %cst_214 = arith.constant dense<0.000000e+00> : vector<8x256xf32>
    %296 = tpu.matmul %295, %293, %cst_214 {dimension_numbers = #tpu.dot_dimension_numbers<[1], [0], [0], [1], [0, 0, 1, 1], [], []>} : vector<8x4xbf16>, vector<4x256xbf16>, vector<8x256xf32> -> vector<8x256xf32>
    %297 = arith.addf %286, %296 : vector<8x256xf32>
    %cst_215 = arith.constant 0.000000e+00 : bf16
    %298 = vector.broadcast %cst_215 : bf16 to vector<4x17xbf16>
    %299 = vector.extract_strided_slice %213 {offsets = [0, 17], sizes = [4, 239], strides = [1, 1]} : vector<4x256xbf16> to vector<4x239xbf16>
    %300 = tpu.concatenate %299, %298 in 1 : vector<4x239xbf16>, vector<4x17xbf16> -> vector<4x256xbf16>
    %c8_216 = arith.constant 8 : index
    %c0_217 = arith.constant 0 : index
    %c0_218 = arith.constant 0 : index
    %301 = vector.load %arg2[%c8_216, %c0_217, %c0_218] : memref<9x1x256xbf16, #tpu.memory_space<vmem>>, vector<1x1x256xbf16>
    %302 = vector.shape_cast %301 : vector<1x1x256xbf16> to vector<1x256xbf16>
    %303 = vector.broadcast %302 : vector<1x256xbf16> to vector<4x256xbf16>
    %304 = arith.mulf %300, %303 : vector<4x256xbf16>
    %c8_219 = arith.constant 8 : index
    %c0_220 = arith.constant 0 : index
    %c0_221 = arith.constant 0 : index
    %305 = vector.load %arg4[%c8_219, %c0_220, %c0_221] : memref<9x8x4xbf16, #tpu.memory_space<vmem>>, vector<1x8x4xbf16>
    %306 = vector.shape_cast %305 : vector<1x8x4xbf16> to vector<8x4xbf16>
    %cst_222 = arith.constant dense<0.000000e+00> : vector<8x256xf32>
    %307 = tpu.matmul %306, %304, %cst_222 {dimension_numbers = #tpu.dot_dimension_numbers<[1], [0], [0], [1], [0, 0, 1, 1], [], []>} : vector<8x4xbf16>, vector<4x256xbf16>, vector<8x256xf32> -> vector<8x256xf32>
    %308 = arith.addf %297, %307 : vector<8x256xf32>
    %c0_223 = arith.constant 0 : index
    %c0_224 = arith.constant 0 : index
    %309 = vector.load %arg5[%c0_223, %c0_224] : memref<8x1xf32, #tpu.memory_space<vmem>>, vector<8x1xf32>
    %310 = vector.broadcast %309 : vector<8x1xf32> to vector<8x256xf32>
    %311 = arith.addf %308, %310 : vector<8x256xf32>
    %cst_225 = arith.constant 0.000000e+00 : f32
    %312 = vector.broadcast %cst_225 : f32 to vector<8x256xf32>
    %313 = arith.maximumf %311, %312 : vector<8x256xf32>
    %314 = arith.truncf %313 : vector<8x256xf32> to vector<8x256xbf16>
    %c0_226 = arith.constant 0 : index
    %c0_227 = arith.constant 0 : index
    %315 = vector.load %arg8[%c0_226, %c0_227] : memref<8x4xbf16, #tpu.memory_space<vmem>>, vector<8x4xbf16>
    %cst_228 = arith.constant dense<0.000000e+00> : vector<8x256xf32>
    %316 = tpu.matmul %315, %213, %cst_228 {dimension_numbers = #tpu.dot_dimension_numbers<[1], [0], [0], [1], [0, 0, 1, 1], [], []>} : vector<8x4xbf16>, vector<4x256xbf16>, vector<8x256xf32> -> vector<8x256xf32>
    %c0_229 = arith.constant 0 : index
    %c0_230 = arith.constant 0 : index
    %317 = vector.load %arg9[%c0_229, %c0_230] : memref<8x1xf32, #tpu.memory_space<vmem>>, vector<8x1xf32>
    %318 = vector.broadcast %317 : vector<8x1xf32> to vector<8x256xf32>
    %319 = arith.addf %316, %318 : vector<8x256xf32>
    %cst_231 = arith.constant 0.000000e+00 : bf16
    %320 = vector.broadcast %cst_231 : bf16 to vector<8x17xbf16>
    %321 = vector.extract_strided_slice %314 {offsets = [0, 0], sizes = [8, 239], strides = [1, 1]} : vector<8x256xbf16> to vector<8x239xbf16>
    %322 = tpu.concatenate %320, %321 in 1 : vector<8x17xbf16>, vector<8x239xbf16> -> vector<8x256xbf16>
    %c0_232 = arith.constant 0 : index
    %c0_233 = arith.constant 0 : index
    %c0_234 = arith.constant 0 : index
    %323 = vector.load %arg3[%c0_232, %c0_233, %c0_234] : memref<9x1x256xbf16, #tpu.memory_space<vmem>>, vector<1x1x256xbf16>
    %324 = vector.shape_cast %323 : vector<1x1x256xbf16> to vector<1x256xbf16>
    %325 = vector.broadcast %324 : vector<1x256xbf16> to vector<8x256xbf16>
    %326 = arith.mulf %322, %325 : vector<8x256xbf16>
    %c0_235 = arith.constant 0 : index
    %c0_236 = arith.constant 0 : index
    %c0_237 = arith.constant 0 : index
    %327 = vector.load %arg6[%c0_235, %c0_236, %c0_237] : memref<9x8x8xbf16, #tpu.memory_space<vmem>>, vector<1x8x8xbf16>
    %328 = vector.shape_cast %327 : vector<1x8x8xbf16> to vector<8x8xbf16>
    %cst_238 = arith.constant dense<0.000000e+00> : vector<8x256xf32>
    %329 = tpu.matmul %328, %326, %cst_238 {dimension_numbers = #tpu.dot_dimension_numbers<[1], [0], [0], [1], [0, 0, 1, 1], [], []>} : vector<8x8xbf16>, vector<8x256xbf16>, vector<8x256xf32> -> vector<8x256xf32>
    %cst_239 = arith.constant 0.000000e+00 : bf16
    %330 = vector.broadcast %cst_239 : bf16 to vector<8x16xbf16>
    %331 = vector.extract_strided_slice %314 {offsets = [0, 0], sizes = [8, 240], strides = [1, 1]} : vector<8x256xbf16> to vector<8x240xbf16>
    %332 = tpu.concatenate %330, %331 in 1 : vector<8x16xbf16>, vector<8x240xbf16> -> vector<8x256xbf16>
    %c1_240 = arith.constant 1 : index
    %c0_241 = arith.constant 0 : index
    %c0_242 = arith.constant 0 : index
    %333 = vector.load %arg3[%c1_240, %c0_241, %c0_242] : memref<9x1x256xbf16, #tpu.memory_space<vmem>>, vector<1x1x256xbf16>
    %334 = vector.shape_cast %333 : vector<1x1x256xbf16> to vector<1x256xbf16>
    %335 = vector.broadcast %334 : vector<1x256xbf16> to vector<8x256xbf16>
    %336 = arith.mulf %332, %335 : vector<8x256xbf16>
    %c1_243 = arith.constant 1 : index
    %c0_244 = arith.constant 0 : index
    %c0_245 = arith.constant 0 : index
    %337 = vector.load %arg6[%c1_243, %c0_244, %c0_245] : memref<9x8x8xbf16, #tpu.memory_space<vmem>>, vector<1x8x8xbf16>
    %338 = vector.shape_cast %337 : vector<1x8x8xbf16> to vector<8x8xbf16>
    %cst_246 = arith.constant dense<0.000000e+00> : vector<8x256xf32>
    %339 = tpu.matmul %338, %336, %cst_246 {dimension_numbers = #tpu.dot_dimension_numbers<[1], [0], [0], [1], [0, 0, 1, 1], [], []>} : vector<8x8xbf16>, vector<8x256xbf16>, vector<8x256xf32> -> vector<8x256xf32>
    %340 = arith.addf %329, %339 : vector<8x256xf32>
    %cst_247 = arith.constant 0.000000e+00 : bf16
    %341 = vector.broadcast %cst_247 : bf16 to vector<8x15xbf16>
    %342 = vector.extract_strided_slice %314 {offsets = [0, 0], sizes = [8, 241], strides = [1, 1]} : vector<8x256xbf16> to vector<8x241xbf16>
    %343 = tpu.concatenate %341, %342 in 1 : vector<8x15xbf16>, vector<8x241xbf16> -> vector<8x256xbf16>
    %c2_248 = arith.constant 2 : index
    %c0_249 = arith.constant 0 : index
    %c0_250 = arith.constant 0 : index
    %344 = vector.load %arg3[%c2_248, %c0_249, %c0_250] : memref<9x1x256xbf16, #tpu.memory_space<vmem>>, vector<1x1x256xbf16>
    %345 = vector.shape_cast %344 : vector<1x1x256xbf16> to vector<1x256xbf16>
    %346 = vector.broadcast %345 : vector<1x256xbf16> to vector<8x256xbf16>
    %347 = arith.mulf %343, %346 : vector<8x256xbf16>
    %c2_251 = arith.constant 2 : index
    %c0_252 = arith.constant 0 : index
    %c0_253 = arith.constant 0 : index
    %348 = vector.load %arg6[%c2_251, %c0_252, %c0_253] : memref<9x8x8xbf16, #tpu.memory_space<vmem>>, vector<1x8x8xbf16>
    %349 = vector.shape_cast %348 : vector<1x8x8xbf16> to vector<8x8xbf16>
    %cst_254 = arith.constant dense<0.000000e+00> : vector<8x256xf32>
    %350 = tpu.matmul %349, %347, %cst_254 {dimension_numbers = #tpu.dot_dimension_numbers<[1], [0], [0], [1], [0, 0, 1, 1], [], []>} : vector<8x8xbf16>, vector<8x256xbf16>, vector<8x256xf32> -> vector<8x256xf32>
    %351 = arith.addf %340, %350 : vector<8x256xf32>
    %cst_255 = arith.constant 0.000000e+00 : bf16
    %352 = vector.broadcast %cst_255 : bf16 to vector<8x1xbf16>
    %353 = vector.extract_strided_slice %314 {offsets = [0, 0], sizes = [8, 255], strides = [1, 1]} : vector<8x256xbf16> to vector<8x255xbf16>
    %354 = tpu.concatenate %352, %353 in 1 : vector<8x1xbf16>, vector<8x255xbf16> -> vector<8x256xbf16>
    %c3_256 = arith.constant 3 : index
    %c0_257 = arith.constant 0 : index
    %c0_258 = arith.constant 0 : index
    %355 = vector.load %arg3[%c3_256, %c0_257, %c0_258] : memref<9x1x256xbf16, #tpu.memory_space<vmem>>, vector<1x1x256xbf16>
    %356 = vector.shape_cast %355 : vector<1x1x256xbf16> to vector<1x256xbf16>
    %357 = vector.broadcast %356 : vector<1x256xbf16> to vector<8x256xbf16>
    %358 = arith.mulf %354, %357 : vector<8x256xbf16>
    %c3_259 = arith.constant 3 : index
    %c0_260 = arith.constant 0 : index
    %c0_261 = arith.constant 0 : index
    %359 = vector.load %arg6[%c3_259, %c0_260, %c0_261] : memref<9x8x8xbf16, #tpu.memory_space<vmem>>, vector<1x8x8xbf16>
    %360 = vector.shape_cast %359 : vector<1x8x8xbf16> to vector<8x8xbf16>
    %cst_262 = arith.constant dense<0.000000e+00> : vector<8x256xf32>
    %361 = tpu.matmul %360, %358, %cst_262 {dimension_numbers = #tpu.dot_dimension_numbers<[1], [0], [0], [1], [0, 0, 1, 1], [], []>} : vector<8x8xbf16>, vector<8x256xbf16>, vector<8x256xf32> -> vector<8x256xf32>
    %362 = arith.addf %351, %361 : vector<8x256xf32>
    %c4_263 = arith.constant 4 : index
    %c0_264 = arith.constant 0 : index
    %c0_265 = arith.constant 0 : index
    %363 = vector.load %arg3[%c4_263, %c0_264, %c0_265] : memref<9x1x256xbf16, #tpu.memory_space<vmem>>, vector<1x1x256xbf16>
    %364 = vector.shape_cast %363 : vector<1x1x256xbf16> to vector<1x256xbf16>
    %365 = vector.broadcast %364 : vector<1x256xbf16> to vector<8x256xbf16>
    %366 = arith.mulf %314, %365 : vector<8x256xbf16>
    %c4_266 = arith.constant 4 : index
    %c0_267 = arith.constant 0 : index
    %c0_268 = arith.constant 0 : index
    %367 = vector.load %arg6[%c4_266, %c0_267, %c0_268] : memref<9x8x8xbf16, #tpu.memory_space<vmem>>, vector<1x8x8xbf16>
    %368 = vector.shape_cast %367 : vector<1x8x8xbf16> to vector<8x8xbf16>
    %cst_269 = arith.constant dense<0.000000e+00> : vector<8x256xf32>
    %369 = tpu.matmul %368, %366, %cst_269 {dimension_numbers = #tpu.dot_dimension_numbers<[1], [0], [0], [1], [0, 0, 1, 1], [], []>} : vector<8x8xbf16>, vector<8x256xbf16>, vector<8x256xf32> -> vector<8x256xf32>
    %370 = arith.addf %362, %369 : vector<8x256xf32>
    %cst_270 = arith.constant 0.000000e+00 : bf16
    %371 = vector.broadcast %cst_270 : bf16 to vector<8x1xbf16>
    %372 = vector.extract_strided_slice %314 {offsets = [0, 1], sizes = [8, 255], strides = [1, 1]} : vector<8x256xbf16> to vector<8x255xbf16>
    %373 = tpu.concatenate %372, %371 in 1 : vector<8x255xbf16>, vector<8x1xbf16> -> vector<8x256xbf16>
    %c5_271 = arith.constant 5 : index
    %c0_272 = arith.constant 0 : index
    %c0_273 = arith.constant 0 : index
    %374 = vector.load %arg3[%c5_271, %c0_272, %c0_273] : memref<9x1x256xbf16, #tpu.memory_space<vmem>>, vector<1x1x256xbf16>
    %375 = vector.shape_cast %374 : vector<1x1x256xbf16> to vector<1x256xbf16>
    %376 = vector.broadcast %375 : vector<1x256xbf16> to vector<8x256xbf16>
    %377 = arith.mulf %373, %376 : vector<8x256xbf16>
    %c5_274 = arith.constant 5 : index
    %c0_275 = arith.constant 0 : index
    %c0_276 = arith.constant 0 : index
    %378 = vector.load %arg6[%c5_274, %c0_275, %c0_276] : memref<9x8x8xbf16, #tpu.memory_space<vmem>>, vector<1x8x8xbf16>
    %379 = vector.shape_cast %378 : vector<1x8x8xbf16> to vector<8x8xbf16>
    %cst_277 = arith.constant dense<0.000000e+00> : vector<8x256xf32>
    %380 = tpu.matmul %379, %377, %cst_277 {dimension_numbers = #tpu.dot_dimension_numbers<[1], [0], [0], [1], [0, 0, 1, 1], [], []>} : vector<8x8xbf16>, vector<8x256xbf16>, vector<8x256xf32> -> vector<8x256xf32>
    %381 = arith.addf %370, %380 : vector<8x256xf32>
    %cst_278 = arith.constant 0.000000e+00 : bf16
    %382 = vector.broadcast %cst_278 : bf16 to vector<8x15xbf16>
    %383 = vector.extract_strided_slice %314 {offsets = [0, 15], sizes = [8, 241], strides = [1, 1]} : vector<8x256xbf16> to vector<8x241xbf16>
    %384 = tpu.concatenate %383, %382 in 1 : vector<8x241xbf16>, vector<8x15xbf16> -> vector<8x256xbf16>
    %c6_279 = arith.constant 6 : index
    %c0_280 = arith.constant 0 : index
    %c0_281 = arith.constant 0 : index
    %385 = vector.load %arg3[%c6_279, %c0_280, %c0_281] : memref<9x1x256xbf16, #tpu.memory_space<vmem>>, vector<1x1x256xbf16>
    %386 = vector.shape_cast %385 : vector<1x1x256xbf16> to vector<1x256xbf16>
    %387 = vector.broadcast %386 : vector<1x256xbf16> to vector<8x256xbf16>
    %388 = arith.mulf %384, %387 : vector<8x256xbf16>
    %c6_282 = arith.constant 6 : index
    %c0_283 = arith.constant 0 : index
    %c0_284 = arith.constant 0 : index
    %389 = vector.load %arg6[%c6_282, %c0_283, %c0_284] : memref<9x8x8xbf16, #tpu.memory_space<vmem>>, vector<1x8x8xbf16>
    %390 = vector.shape_cast %389 : vector<1x8x8xbf16> to vector<8x8xbf16>
    %cst_285 = arith.constant dense<0.000000e+00> : vector<8x256xf32>
    %391 = tpu.matmul %390, %388, %cst_285 {dimension_numbers = #tpu.dot_dimension_numbers<[1], [0], [0], [1], [0, 0, 1, 1], [], []>} : vector<8x8xbf16>, vector<8x256xbf16>, vector<8x256xf32> -> vector<8x256xf32>
    %392 = arith.addf %381, %391 : vector<8x256xf32>
    %cst_286 = arith.constant 0.000000e+00 : bf16
    %393 = vector.broadcast %cst_286 : bf16 to vector<8x16xbf16>
    %394 = vector.extract_strided_slice %314 {offsets = [0, 16], sizes = [8, 240], strides = [1, 1]} : vector<8x256xbf16> to vector<8x240xbf16>
    %395 = tpu.concatenate %394, %393 in 1 : vector<8x240xbf16>, vector<8x16xbf16> -> vector<8x256xbf16>
    %c7_287 = arith.constant 7 : index
    %c0_288 = arith.constant 0 : index
    %c0_289 = arith.constant 0 : index
    %396 = vector.load %arg3[%c7_287, %c0_288, %c0_289] : memref<9x1x256xbf16, #tpu.memory_space<vmem>>, vector<1x1x256xbf16>
    %397 = vector.shape_cast %396 : vector<1x1x256xbf16> to vector<1x256xbf16>
    %398 = vector.broadcast %397 : vector<1x256xbf16> to vector<8x256xbf16>
    %399 = arith.mulf %395, %398 : vector<8x256xbf16>
    %c7_290 = arith.constant 7 : index
    %c0_291 = arith.constant 0 : index
    %c0_292 = arith.constant 0 : index
    %400 = vector.load %arg6[%c7_290, %c0_291, %c0_292] : memref<9x8x8xbf16, #tpu.memory_space<vmem>>, vector<1x8x8xbf16>
    %401 = vector.shape_cast %400 : vector<1x8x8xbf16> to vector<8x8xbf16>
    %cst_293 = arith.constant dense<0.000000e+00> : vector<8x256xf32>
    %402 = tpu.matmul %401, %399, %cst_293 {dimension_numbers = #tpu.dot_dimension_numbers<[1], [0], [0], [1], [0, 0, 1, 1], [], []>} : vector<8x8xbf16>, vector<8x256xbf16>, vector<8x256xf32> -> vector<8x256xf32>
    %403 = arith.addf %392, %402 : vector<8x256xf32>
    %cst_294 = arith.constant 0.000000e+00 : bf16
    %404 = vector.broadcast %cst_294 : bf16 to vector<8x17xbf16>
    %405 = vector.extract_strided_slice %314 {offsets = [0, 17], sizes = [8, 239], strides = [1, 1]} : vector<8x256xbf16> to vector<8x239xbf16>
    %406 = tpu.concatenate %405, %404 in 1 : vector<8x239xbf16>, vector<8x17xbf16> -> vector<8x256xbf16>
    %c8_295 = arith.constant 8 : index
    %c0_296 = arith.constant 0 : index
    %c0_297 = arith.constant 0 : index
    %407 = vector.load %arg3[%c8_295, %c0_296, %c0_297] : memref<9x1x256xbf16, #tpu.memory_space<vmem>>, vector<1x1x256xbf16>
    %408 = vector.shape_cast %407 : vector<1x1x256xbf16> to vector<1x256xbf16>
    %409 = vector.broadcast %408 : vector<1x256xbf16> to vector<8x256xbf16>
    %410 = arith.mulf %406, %409 : vector<8x256xbf16>
    %c8_298 = arith.constant 8 : index
    %c0_299 = arith.constant 0 : index
    %c0_300 = arith.constant 0 : index
    %411 = vector.load %arg6[%c8_298, %c0_299, %c0_300] : memref<9x8x8xbf16, #tpu.memory_space<vmem>>, vector<1x8x8xbf16>
    %412 = vector.shape_cast %411 : vector<1x8x8xbf16> to vector<8x8xbf16>
    %cst_301 = arith.constant dense<0.000000e+00> : vector<8x256xf32>
    %413 = tpu.matmul %412, %410, %cst_301 {dimension_numbers = #tpu.dot_dimension_numbers<[1], [0], [0], [1], [0, 0, 1, 1], [], []>} : vector<8x8xbf16>, vector<8x256xbf16>, vector<8x256xf32> -> vector<8x256xf32>
    %414 = arith.addf %403, %413 : vector<8x256xf32>
    %c0_302 = arith.constant 0 : index
    %c0_303 = arith.constant 0 : index
    %415 = vector.load %arg7[%c0_302, %c0_303] : memref<8x1xf32, #tpu.memory_space<vmem>>, vector<8x1xf32>
    %416 = vector.broadcast %415 : vector<8x1xf32> to vector<8x256xf32>
    %417 = arith.addf %414, %416 : vector<8x256xf32>
    %418 = arith.addf %417, %319 : vector<8x256xf32>
    %cst_304 = arith.constant 0.000000e+00 : f32
    %419 = vector.broadcast %cst_304 : f32 to vector<8x256xf32>
    %420 = arith.maximumf %418, %419 : vector<8x256xf32>
    %c1_305 = arith.constant 1 : index
    %c0_306 = arith.constant 0 : index
    %c0_307 = arith.constant 0 : index
    %421 = vector.load %arg10[%c1_305, %c0_306, %c0_307] : memref<2x8x256xf32, #tpu.memory_space<vmem>>, vector<1x8x256xf32>
    %422 = vector.shape_cast %421 : vector<1x8x256xf32> to vector<8x256xf32>
    %423 = vector.shape_cast %420 : vector<8x256xf32> to vector<1x8x256xf32>
    tpu.vector_store %arg10[%c1_305, %c0_306, %c0_307], %423 {strides = array<i32>} : memref<2x8x256xf32, #tpu.memory_space<vmem>>, vector<1x8x256xf32>,
    return
  }
  func.func @transform_0(%arg0: i32) -> (i32, i32, i32) {
    %c0_i32 = arith.constant 0 : i32
    %c0_i32_0 = arith.constant 0 : i32
    %c0_i32_1 = arith.constant 0 : i32
    return %arg0, %c0_i32, %c0_i32_0 : i32, i32, i32
  }
  func.func @transform_1(%arg0: i32) -> (i32, i32, i32) {
    %c0_i32 = arith.constant 0 : i32
    %c0_i32_0 = arith.constant 0 : i32
    %c0_i32_1 = arith.constant 0 : i32
    %c0_i32_2 = arith.constant 0 : i32
    return %c0_i32, %c0_i32_0, %c0_i32_1 : i32, i32, i32
  }
  func.func @transform_2(%arg0: i32) -> (i32, i32, i32) {
    %c0_i32 = arith.constant 0 : i32
    %c0_i32_0 = arith.constant 0 : i32
    %c0_i32_1 = arith.constant 0 : i32
    %c0_i32_2 = arith.constant 0 : i32
    return %c0_i32, %c0_i32_0, %c0_i32_1 : i32, i32, i32
  }
  func.func @transform_3(%arg0: i32) -> (i32, i32, i32) {
    %c0_i32 = arith.constant 0 : i32
    %c0_i32_0 = arith.constant 0 : i32
    %c0_i32_1 = arith.constant 0 : i32
    %c0_i32_2 = arith.constant 0 : i32
    return %c0_i32, %c0_i32_0, %c0_i32_1 : i32, i32, i32
  }
  func.func @transform_4(%arg0: i32) -> (i32, i32) {
    %c0_i32 = arith.constant 0 : i32
    %c0_i32_0 = arith.constant 0 : i32
    %c0_i32_1 = arith.constant 0 : i32
    return %c0_i32, %c0_i32_0 : i32, i32
  }
  func.func @transform_5(%arg0: i32) -> (i32, i32, i32) {
    %c0_i32 = arith.constant 0 : i32
    %c0_i32_0 = arith.constant 0 : i32
    %c0_i32_1 = arith.constant 0 : i32
    %c0_i32_2 = arith.constant 0 : i32
    return %c0_i32, %c0_i32_0, %c0_i32_1 : i32, i32, i32
  }
  func.func @transform_6(%arg0: i32) -> (i32, i32) {
    %c0_i32 = arith.constant 0 : i32
    %c0_i32_0 = arith.constant 0 : i32
    %c0_i32_1 = arith.constant 0 : i32
    return %c0_i32, %c0_i32_0 : i32, i32
  }
  func.func @transform_7(%arg0: i32) -> (i32, i32) {
    %c0_i32 = arith.constant 0 : i32
    %c0_i32_0 = arith.constant 0 : i32
    %c0_i32_1 = arith.constant 0 : i32
    return %c0_i32, %c0_i32_0 : i32, i32
  }
  func.func @transform_8(%arg0: i32) -> (i32, i32) {
    %c0_i32 = arith.constant 0 : i32
    %c0_i32_0 = arith.constant 0 : i32
    %c0_i32_1 = arith.constant 0 : i32
    return %c0_i32, %c0_i32_0 : i32, i32
  }
  func.func @transform_9(%arg0: i32) -> (i32, i32, i32) {
    %c0_i32 = arith.constant 0 : i32
    %c0_i32_0 = arith.constant 0 : i32
    %c0_i32_1 = arith.constant 0 : i32
    return %arg0, %c0_i32, %c0_i32_0 : i32, i32, i32
  }
}

</mosaic_0001>

<bundles_post_ra>
// kernel: tpu_custom_call.1
= control target key start
LH: loop header
LB: loop body
LE: loop exit
PB: predicated region body
PF: predicated region fallthrough
CT: control target
= control target key end

     0   :  { %v39_v0 = vlaneseq  ;;  %v4167_v1 = vmov 1983009808   ;;  %s5035_s0 = inlined_call_operand.vmem [shape: bf16[2,4,256], index: 0, kind: input, shape index: {}]   ;;  %s5036_s1 = inlined_call_operand.vmem [shape: bf16[9,1,256], index: 1, kind: input, shape index: {}]   ;;  %s5037_s2 = inlined_call_operand.vmem [shape: bf16[9,1,256], index: 2, kind: input, shape index: {}]   ;;  %s5038_s3 = inlined_call_operand.vmem [shape: bf16[9,8,4], index: 3, kind: input, shape index: {}]   ;;  %s5039_s4 = inlined_call_operand.vmem [shape: f32[8,1], index: 4, kind: input, shape index: {}]   ;;  %s5040_s5 = inlined_call_operand.vmem [shape: bf16[9,8,8], index: 5, kind: input, shape index: {}]   ;;  %s5041_s6 = inlined_call_operand.vmem [shape: f32[8,1], index: 6, kind: input, shape index: {}]   ;;  %s5042_s7 = inlined_call_operand.vmem [shape: bf16[8,4], index: 7, kind: input, shape index: {}]   ;;  %s5043_s8 = inlined_call_operand.vmem [shape: f32[8,1], index: 8, kind: input, shape index: {}]   ;;  %s5044_s9 = inlined_call_operand.hbm [shape: f32[2,8,256], index: 9, kind: output, shape index: {}]  }
   0x1   :  { %v37_v2 = vunpack.c.l.s4 %v4167_v1 }
   0x2   :  { %v40_v3 = vshrl.u32 %v39_v0, 7 }
   0x3   :  { %14 = vsyncpa [#allocation3], 0  ;;  %v38_v4 = vunpack.c.0.s8 %v37_v2  ;;  %v4233_v5 = vld [vmem:[%s5035_s0] sm:$0xf]  ;;  %v4168_v7 = vmov 0   ;;  %s4169_s11 = smov 17  }
   0x4   :  { %194 = vmatprep.mubr.bf16.mxu0 %v4168_v7  ;;  %244 = vmatprep.mubr.bf16.mxu1 %v4168_v7  ;;  %s4170_s12 = smov 16   ;;  %s4171_s13 = smov 15   ;;  %v4284_v10 = vld [vmem:[%s5039_s4] sm:$0xff]  ;;  %v4177_v11 = vmov 1966171168   ;;  %v4300_v23 = vsub.s32 0, %v40_v3 }
   0x5   :  { %v4235_v6 = vsub.s32 %v38_v4, %v40_v3  ;;  %4143 = vset.pattern.permute.xlu0 %v4168_v7  ;;  %4144 = vset.pattern.permute.xlu1 %v4168_v7  ;;  %s4172_s14 = smov 1   ;;  %s4173_s15 = smov 127   ;;  %v67_v12 = vunpack.c.l.s4 %v4177_v11  ;;  %v3972_v13 = vld.sshfl [vmem:[%s5036_s1 + $0x8] sm:$0x11 pattern:$0x75316420] }
   0x6   :  { %s4174_s16 = smov 113   ;;  %s4175_s17 = smov 112   ;;  %v475_v15 = vcombine.high %v3972_v13, %v3972_v13  ;;  %v3953_v19 = vld.sshfl [vmem:[%s5036_s1] sm:$0x11 pattern:$0x75316420] }
   0x7   :  { %v4241_v8 = vrot.slane %v4233_v5, %v4235_v6  ;;  %s4176_s18 = smov 111   ;;  %v68_v14 = vunpack.c.0.s8 %v67_v12  ;;  %v3955_v22 = vld.sshfl [vmem:[%s5036_s1 + $0x2] sm:$0x11 pattern:$0x75316420]  ;;  %v65_v25 = vcombine.high %v3953_v19, %v3953_v19  ;;  %vm48_vm0 = vcmask 138240  }
   0x8   :  { %v3962_v24 = vld.sshfl [vmem:[%s5036_s1 + $0x4] sm:$0x11 pattern:$0x75316420]  ;;  %v118_v26 = vcombine.high %v3955_v22, %v3955_v22  ;;  %vm101_vm1 = vcmask 130048   ;;  %vm155_vm2 = vcmask 1041408  }
   0x9   :  { %44 = vrot.lane.b32.xlu1 %v4241_v8, %s4169_s11  ;;  %97 = vrot.lane.b32.xlu0 %v4241_v8, %s4170_s12  ;;  %v4251_v9 = vcombine.high %v4241_v8, %v4241_v8  ;;  %v4290_v16 = vsub.s32 %v68_v14, %v40_v3  ;;  %v274_v30 = vcombine.high %v3962_v24, %v3962_v24  ;;  %v3967_v35 = vld.sshfl [vmem:[%s5036_s1 + $0x6] sm:$0x11 pattern:$0x75316420]  ;;  %vm257_vm3 = vcmask 121856  }
   0xa   :  { %v380_v40 = vcombine.high %v3967_v35, %v3967_v35  ;;  %v3977_v44 = vld.sshfl [vmem:[%s5036_s1 + $0xa] sm:$0x11 pattern:$0x75316420]  ;;  %vm151_vm4 = vcmask 31744   ;;  %vm363_vm5 = vcmask 7168  }
   0xb   :  { %v482_v17 = vrot.slane %v3972_v13, %v4290_v16  ;;  %v489_v18 = vrot.slane %v475_v15, %v4290_v16  ;;  %v72_v27 = vrot.slane %v3953_v19, %v4290_v16  ;;  %v125_v31 = vrot.slane %v3955_v22, %v4290_v16  ;;  %v3982_v55 = vld.sshfl [vmem:[%s5036_s1 + $0xc] sm:$0x11 pattern:$0x75316420] }
   0xc   :  { %v79_v32 = vrot.slane %v65_v25, %v4290_v16  ;;  %v132_v33 = vrot.slane %v118_v26, %v4290_v16  ;;  %v281_v37 = vrot.slane %v3962_v24, %v4290_v16  ;;  %v288_v38 = vrot.slane %v274_v30, %v4290_v16  ;;  %v3956_v30 = vld [vmem:[%s5038_s3 + $0x4] sm:$0xf] }
   0xd   :  { %46 = vrot.lane.b32.xlu1 %v4251_v9, %s4169_s11  ;;  %99 = vrot.lane.b32.xlu0 %v4251_v9, %s4170_s12  ;;  %v491_v20 = vpack.i.b16 %v482_v17, %v482_v17  ;;  %v498_v21 = vpack.i.b16 %v489_v18, %v489_v18  ;;  %v81_v34 = vpack.i.b16 %v72_v27, %v72_v27  ;;  %v3987_v18 = vld.sshfl [vmem:[%s5036_s1 + $0xe] sm:$0x11 pattern:$0x75316420]  ;;  %vm583_vm6 = vcmask 1039360  }
   0xe   :  { %v134_v39 = vpack.i.b16 %v125_v31, %v125_v31  ;;  %v88_v41 = vpack.i.b16 %v79_v32, %v79_v32  ;;  %v141_v42 = vpack.i.b16 %v132_v33, %v132_v33  ;;  %v290_v48 = vpack.i.b16 %v281_v37, %v281_v37  ;;  %v3992_v37 = vld.sshfl [vmem:[%s5036_s1 + $0x10] sm:$0x11 pattern:$0x75316420] }
   0xf   :  { %v496_v28 = vrot.slane %v491_v20, %v4300_v23  ;;  %v503_v29 = vrot.slane %v498_v21, %v4300_v23  ;;  %v4317_v43 = vrot.slane %v81_v34, %v4300_v23  ;;  %v297_v49 = vpack.i.b16 %v288_v38, %v288_v38 }
  0x10   :  { %v4326_v50 = vrot.slane %v134_v39, %v4300_v23  ;;  %v387_v53 = vrot.slane %v3967_v35, %v4290_v16  ;;  %v394_v54 = vrot.slane %v380_v40, %v4290_v16  ;;  %v4336_v56 = vrot.slane %v88_v41, %v4300_v23 }
  0x11   :  { %255 = vrot.lane.b32.xlu1 %v4251_v9, %s4171_s13  ;;  %253 = vrot.lane.b32.xlu0 %v4241_v8, %s4171_s13  ;;  %v506_v36 = vcombine.low %v496_v28, %v503_v29  ;;  %v4339_v57 = vrot.slane %v141_v42, %v4300_v23  ;;  %v600_v59 = vcombine.high %v3977_v44, %v3977_v44  ;;  %v96_v29 = vld [vmem:[%s5038_s3] sm:$0xf]  ;;  %vm689_vm7 = vcmask 924672  }
  0x12   :  { %v607_v60 = vrot.slane %v3977_v44, %v4290_v16  ;;  %v4346_v0 = vrot.slane %v290_v48, %v4300_v23  ;;  %v4349_v1 = vrot.slane %v297_v49, %v4300_v23  ;;  %v706_v3 = vcombine.high %v3982_v55, %v3982_v55 }
  0x13   :  { %v4323_v45 = vrot.slane %v506_v36, %v4235_v6  ;;  %v396_v12 = vpack.i.b16 %v387_v53, %v387_v53  ;;  %v403_v13 = vpack.i.b16 %v394_v54, %v394_v54  ;;  %v614_v17 = vrot.slane %v600_v59, %v4290_v16 }
  0x14   :  { %v616_v19 = vpack.i.b16 %v607_v60, %v607_v60  ;;  %v720_v25 = vrot.slane %v706_v3, %v4290_v16  ;;  %v713_v26 = vrot.slane %v3982_v55, %v4290_v16  ;;  %v812_v32 = vcombine.high %v3987_v18, %v3987_v18  ;;  %v3963_v3 = vld [vmem:[%s5038_s3 + $0x8] sm:$0xf] }
  0x15   :  { %361 = vrot.lane.b32.xlu1 %v4251_v9, %s4172_s14  ;;  %359 = vrot.lane.b32.xlu0 %v4241_v8, %s4172_s14  ;;  %v515_v61 = vmul.bf16 %v4323_v45, %v4233_v5  ;;  %v4376_v31 = vrot.slane %v396_v12, %v4300_v23  ;;  %v4381_v35 = vrot.slane %v403_v13, %v4300_v23  ;;  %vm795_vm8 = vcmask 916480  }
  0x16   :  { %v623_v36 = vpack.i.b16 %v614_v17, %v614_v17  ;;  %v4387_v38 = vrot.slane %v616_v19, %v4300_v23  ;;  %v729_v44 = vpack.i.b16 %v720_v25, %v720_v25  ;;  %v925_v17 = vrot.slane %v3992_v37, %v4290_v16 }
  0x17   :  { %v525_v20 = vrot.slane %v515_v61, %v4235_v6  ;;  %vm901_vm9 = vcmask 908288   ;;  %vm1180_vm10 = vcmask 1043456   ;;  %vm1176_vm11 = vcmask 64512  }
  0x18   :  { %v4402_v55 = vrot.slane %v623_v36, %v4300_v23  ;;  %v4408_v61 = vrot.slane %v729_v44, %v4300_v23  ;;  %v3978_v36 = vld [vmem:[%s5038_s3 + $0x14] sm:$0xf] }
  0x19   :  { %581 = vrot.lane.b32.xlu1 %v4251_v9, %s4173_s15  ;;  %579 = vrot.lane.b32.xlu0 %v4241_v8, %s4173_s15  ;;  %v526_v39 = vcombine.high %v525_v20, %v525_v20 }
  0x1d   :  { %687 = vrot.lane.b32.xlu1 %v4251_v9, %s4174_s16  ;;  %685 = vrot.lane.b32.xlu0 %v4241_v8, %s4174_s16 }
  0x21   :  { %793 = vrot.lane.b32.xlu1 %v4251_v9, %s4175_s17  ;;  %791 = vrot.lane.b32.xlu0 %v4241_v8, %s4175_s17 }
  0x25   :  { %899 = vrot.lane.b32.xlu1 %v4251_v9, %s4176_s18  ;;  %897 = vrot.lane.b32.xlu0 %v4241_v8, %s4176_s18 }
  0x29   :  { %1006 = vperm.xlu0 %4143, %v4284_v10  }
  0x7b   :  { %v45_v46 = vpop.permute.xlu1 %44  ;;  %v98_v47 = vpop.permute.xlu0 %97 }
  0x7c   :  { %v54_v51 = vsel %vm48_vm0, 0, %v45_v46  ;;  %v106_v52 = vsel %vm101_vm1, 0, %v98_v47 }
  0x7d   :  { %v94_v58 = vmul.bf16 %v4317_v43, %v54_v51  ;;  %v147_v2 = vmul.bf16 %v4326_v50, %v106_v52  ;;  %v826_v51 = vrot.slane %v812_v32, %v4290_v16  ;;  %v918_v52 = vcombine.high %v3992_v37, %v3992_v37 }
  0x7f   :  { %v47_v62 = vpop.permute.xlu1 %46  ;;  %v100_v63 = vpop.permute.xlu0 %99  ;;  %v207_v15 = vsel %vm155_vm2, %v94_v58, 0  ;;  %v157_v24 = vsel %vm155_vm2, %v147_v2, 0  ;;  %v835_v12 = vpack.i.b16 %v826_v51, %v826_v51  ;;  %v932_v13 = vrot.slane %v918_v52, %v4290_v16 }
  0x80   :  { %v49_v4 = vsel %vm48_vm0, %v45_v46, %v47_v62  ;;  %v102_v11 = vsel %vm101_vm1, %v98_v47, %v100_v63  ;;  %v722_v46 = vpack.i.b16 %v713_v26, %v713_v26  ;;  %v819_v47 = vrot.slane %v3987_v18, %v4290_v16 }
  0x81   :  { %v95_v14 = vmul.bf16 %v4336_v56, %v49_v4  ;;  %v148_v5 = vmul.bf16 %v4339_v57, %v102_v11  ;;  %v3968_v4 = vld [vmem:[%s5038_s3 + $0xc] sm:$0xf]  ;;  %v941_v26 = vpack.i.b16 %v932_v13, %v932_v13 }
  0x82   :  { %v4411_v62 = vrot.slane %v722_v46, %v4300_v23  ;;  %v828_v63 = vpack.i.b16 %v819_v47, %v819_v47 }
  0x83   :  { %3959 = vmatprep.subr.msk.bf16.mxu1 %vm155_vm2, %v95_v14  ;;  %v256_v21 = vpop.permute.xlu1 %255  ;;  %3957 = vmatprep.subr.msk.bf16.mxu0 %vm155_vm2, %v148_v5  ;;  %v254_v22 = vpop.permute.xlu0 %253 }
  0x84   :  { %v258_v27 = vsel %vm257_vm3, %v254_v22, %v256_v21  ;;  %v262_v28 = vsel %vm257_vm3, 0, %v254_v22  ;;  %177 = vmatpush1.bf16.msra.mxu0 %v157_v24  ;;  %227 = vmatpush1.bf16.msra.mxu1 %v207_v15  ;;  %v531_v15 = vsel %vm155_vm2, %v525_v20, 0  ;;  %v4430_v22 = vrot.slane %v828_v63, %v4300_v23 }
  0x85   :  { %v303_v33 = vmul.bf16 %v4346_v0, %v262_v28  ;;  %v304_v34 = vmul.bf16 %v4349_v1, %v258_v27  ;;  %v4436_v20 = vrot.slane %v835_v12, %v4300_v23 }
  0x87   :  { %3960 = vmatmul.mubr.msk.bf16.vlgmr.msra.gmra.mxu1 %vm151_vm4, %v96_v29  ;;  %v362_v40 = vpop.permute.xlu1 %361  ;;  %3958 = vmatmul.mubr.msk.bf16.vlgmr.msra.gmra.mxu0 %vm151_vm4, %v3956_v30  ;;  %v360_v41 = vpop.permute.xlu0 %359  ;;  %v311_v42 = vsel %vm155_vm2, %v303_v33, 0  ;;  %v934_v29 = vpack.i.b16 %v925_v17, %v925_v17 }
  0x88   :  { %v364_v48 = vsel %vm363_vm5, %v360_v41, %v362_v40  ;;  %v368_v49 = vsel %vm363_vm5, 0, %v360_v41  ;;  %3964 = vmatprep.subr.msk.bf16.mxu0 %vm155_vm2, %v304_v34  ;;  %348 = vmatprep.mubr.bf16.mxu0 %v4168_v7  ;;  %v3973_v34 = vld [vmem:[%s5038_s3 + $0x10] sm:$0xf] }
  0x89   :  { %v409_v53 = vmul.bf16 %v4376_v31, %v368_v49  ;;  %v410_v54 = vmul.bf16 %v4381_v35, %v364_v48  ;;  %331 = vmatpush1.bf16.msra.mxu0 %v311_v42  ;;  %454 = vmatprep.mubr.bf16.mxu1 %v4168_v7  ;;  %v4458_v44 = vrot.slane %v934_v29, %v4300_v23 }
  0x8a   :  { %3974 = vmatprep.subr.msk.bf16.mxu0 %vm155_vm2, %v526_v39  ;;  %v4452_v39 = vrot.slane %v941_v26, %v4300_v23 }
  0x8b   :  { %3969 = vmatprep.subr.msk.bf16.mxu1 %vm155_vm2, %v410_v54  ;;  %v417_v58 = vsel %vm155_vm2, %v409_v53, 0  ;;  %v582_v59 = vpop.permute.xlu1 %581  ;;  %v580_v60 = vpop.permute.xlu0 %579  ;;  %v3983_v54 = vld [vmem:[%s5038_s3 + $0x18] sm:$0xf] }
  0x8c   :  { %437 = vmatpush1.bf16.msra.mxu1 %v417_v58  ;;  %v588_v2 = vsel %vm583_vm6, %v582_v59, 0  ;;  %v584_v11 = vsel %vm583_vm6, %v580_v60, %v582_v59  ;;  %v3988_v58 = vld [vmem:[%s5038_s3 + $0x1c] sm:$0xf]  ;;  %v1026_v60 = vsel %vm155_vm2, %v4241_v8, 0 }
  0x8d   :  { %v630_v14 = vmul.bf16 %v4402_v55, %v588_v2  ;;  %v629_v5 = vmul.bf16 %v4387_v38, %v584_v11 }
  0x8f   :  { %3965 = vmatmul.mubr.msk.bf16.vlgmr.msra.gmra.mxu0 %vm151_vm4, %v3963_v3  ;;  %3970 = vmatmul.mubr.msk.bf16.vlgmr.msra.gmra.mxu1 %vm151_vm4, %v3968_v4  ;;  %v688_v18 = vpop.permute.xlu1 %687  ;;  %v686_v19 = vpop.permute.xlu0 %685  ;;  %v637_v21 = vsel %vm155_vm2, %v629_v5, 0 }
  0x90   :  { %v694_v24 = vsel %vm689_vm7, %v688_v18, 0  ;;  %3979 = vmatprep.subr.msk.bf16.mxu1 %vm155_vm2, %v630_v14  ;;  %v690_v25 = vsel %vm689_vm7, %v686_v19, %v688_v18  ;;  %551 = vmatpush1.bf16.msra.mxu0 %v531_v15 }
  0x91   :  { %v736_v27 = vmul.bf16 %v4408_v61, %v694_v24  ;;  %v735_v28 = vmul.bf16 %v4411_v62, %v690_v25  ;;  %657 = vmatpush1.bf16.msra.mxu1 %v637_v21  ;;  %568 = vmatprep.mubr.bf16.mxu0 %v4168_v7 }
  0x92   :  { %674 = vmatprep.mubr.bf16.mxu1 %v4168_v7 }
  0x93   :  { %v794_v30 = vpop.permute.xlu1 %793  ;;  %v792_v32 = vpop.permute.xlu0 %791  ;;  %3984 = vmatprep.subr.msk.bf16.mxu0 %vm155_vm2, %v736_v27  ;;  %v743_v42 = vsel %vm155_vm2, %v735_v28, 0 }
  0x94   :  { %v800_v33 = vsel %vm795_vm8, %v794_v30, 0  ;;  %v796_v37 = vsel %vm795_vm8, %v792_v32, %v794_v30 }
  0x95   :  { %v842_v40 = vmul.bf16 %v4436_v20, %v800_v33  ;;  %v841_v41 = vmul.bf16 %v4430_v22, %v796_v37 }
  0x97   :  { %3975 = vmatmul.mubr.msk.bf16.vlgmr.msra.gmra.mxu0 %vm151_vm4, %v3973_v34  ;;  %3980 = vmatmul.mubr.msk.bf16.vlgmr.msra.gmra.mxu1 %vm151_vm4, %v3978_v36  ;;  %v849_v46 = vsel %vm155_vm2, %v841_v41, 0  ;;  %v900_v47 = vpop.permute.xlu1 %899  ;;  %v898_v48 = vpop.permute.xlu0 %897 }
  0x98   :  { %3989 = vmatprep.subr.msk.bf16.mxu1 %vm155_vm2, %v842_v40  ;;  %763 = vmatpush1.bf16.msra.mxu0 %v743_v42  ;;  %v906_v49 = vsel %vm901_vm9, %v900_v47, 0  ;;  %v902_v51 = vsel %vm901_vm9, %v898_v48, %v900_v47 }
  0x99   :  { %869 = vmatpush1.bf16.msra.mxu1 %v849_v46  ;;  %780 = vmatprep.mubr.bf16.mxu0 %v4168_v7  ;;  %v948_v52 = vmul.bf16 %v4452_v39, %v906_v49  ;;  %v947_v53 = vmul.bf16 %v4458_v44, %v902_v51 }
  0x9a   :  { %886 = vmatprep.mubr.bf16.mxu1 %v4168_v7  ;;  %3996 = vmatprep.subr.msk.bf16.mxu1 %vm155_vm2, %v4251_v9  ;;  %v3993_v9 = vld [vmem:[%s5038_s3 + $0x20] sm:$0xf] }
  0x9b   :  { %3994 = vmatprep.subr.msk.bf16.mxu0 %vm155_vm2, %v948_v52  ;;  %v955_v59 = vsel %vm155_vm2, %v947_v53, 0 }
  0x9f   :  { %3985 = vmatmul.mubr.msk.bf16.vlgmr.msra.gmra.mxu0 %vm151_vm4, %v3983_v54  ;;  %3990 = vmatmul.mubr.msk.bf16.vlgmr.msra.gmra.mxu1 %vm151_vm4, %v3988_v58 }
  0xa0   :  { %975 = vmatpush1.bf16.msra.mxu0 %v955_v59  ;;  %992 = vmatprep.mubr.bf16.mxu0 %v4168_v7 }
  0xa1   :  { %1063 = vmatprep.mubr.bf16.mxu1 %v4168_v7  ;;  %1046 = vmatpush1.bf16.msra.mxu1 %v1026_v60  ;;  %v1015_v60 = vld [vmem:[%s5042_s7] sm:$0xf] }
  0xa7   :  { %3995 = vmatmul.mubr.msk.bf16.vlgmr.msra.gmra.mxu0 %vm151_vm4, %v3993_v9  ;;  %3997 = vmatmul.mubr.msk.bf16.vlgmr.msra.gmra.mxu1 %vm151_vm4, %v1015_v60 }
  0xa8   :  { %1219 = vmatprep.mubr.bf16.mxu0 %v4168_v7  ;;  %1269 = vmatprep.mubr.bf16.mxu1 %v4168_v7 }
 0x147   :  { %v196_v63 = vpop.f32.mrf.mxu0  ;;  %v246_v2 = vpop.f32.mrf.mxu1 }
 0x148   :  { %v247_v24 = vadd.f32 %v246_v2, %v196_v63 }
 0x149   :  { %v198_v3 = vpop.f32.mrf.mxu0  ;;  %v248_v4 = vpop.f32.mrf.mxu1 }
 0x14a   :  { %v249_v27 = vadd.f32 %v248_v4, %v198_v3 }
 0x14b   :  { %v200_v11 = vpop.f32.mrf.mxu0  ;;  %v250_v12 = vpop.f32.mrf.mxu1 }
 0x14c   :  { %v1007_v12 = vpop.permute.xlu0 %1006 }
 0x14d   :  { %v201_v13 = vpop.f32.mrf.mxu0  ;;  %v251_v14 = vpop.f32.mrf.mxu1 }
 0x14f   :  { %v350_v5 = vpop.f32.mrf.mxu0  ;;  %v456_v15 = vpop.f32.mrf.mxu1 }
 0x150   :  { %v357_v8 = vadd.f32 %v350_v5, %v247_v24 }
 0x151   :  { %v352_v17 = vpop.f32.mrf.mxu0  ;;  %v458_v18 = vpop.f32.mrf.mxu1 }
 0x152   :  { %v358_v30 = vadd.f32 %v352_v17, %v249_v27  ;;  %v463_v34 = vadd.f32 %v456_v15, %v357_v8  ;;  %v4527_v8 = vld [vmem:[%s5035_s0 + $0x4] sm:$0xf] }
 0x153   :  { %v354_v19 = vpop.f32.mrf.mxu0  ;;  %v460_v21 = vpop.f32.mrf.mxu1 }
 0x154   :  { %v464_v40 = vadd.f32 %v458_v18, %v358_v30  ;;  %v4000_v30 = vld.sshfl [vmem:[%s5037_s2 + $0x2] sm:$0x11 pattern:$0x75316420] }
 0x155   :  { %v355_v25 = vpop.f32.mrf.mxu0  ;;  %v461_v26 = vpop.f32.mrf.mxu1 }
 0x157   :  { %v570_v28 = vpop.f32.mrf.mxu0  ;;  %v676_v29 = vpop.f32.mrf.mxu1 }
 0x158   :  { %v577_v41 = vadd.f32 %v570_v28, %v463_v34  ;;  %v4535_v28 = vrot.slane %v4527_v8, %v4235_v6  ;;  %v3998_v34 = vld.sshfl [vmem:[%s5037_s2] sm:$0x11 pattern:$0x75316420] }
 0x159   :  { %v572_v32 = vpop.f32.mrf.mxu0  ;;  %v678_v33 = vpop.f32.mrf.mxu1 }
 0x15a   :  { %v578_v47 = vadd.f32 %v572_v32, %v464_v40  ;;  %v683_v51 = vadd.f32 %v676_v29, %v577_v41  ;;  %v4547_v29 = vcombine.high %v4535_v28, %v4535_v28  ;;  %v1143_v32 = vcombine.high %v4000_v30, %v4000_v30 }
 0x15b   :  { %v574_v36 = vpop.f32.mrf.mxu0  ;;  %v680_v37 = vpop.f32.mrf.mxu1  ;;  %v1099_v40 = vrot.slane %v3998_v34, %v4290_v16 }
 0x15c   :  { %v684_v54 = vadd.f32 %v678_v33, %v578_v47  ;;  %v1150_v33 = vrot.slane %v4000_v30, %v4290_v16  ;;  %v1157_v36 = vrot.slane %v1143_v32, %v4290_v16  ;;  %v4017_v37 = vld.sshfl [vmem:[%s5037_s2 + $0x8] sm:$0x11 pattern:$0x75316420] }
 0x15d   :  { %v575_v42 = vpop.f32.mrf.mxu0  ;;  %v681_v46 = vpop.f32.mrf.mxu1 }
 0x15e   :  { %v1159_v41 = vpack.i.b16 %v1150_v33, %v1150_v33  ;;  %v4007_v42 = vld.sshfl [vmem:[%s5037_s2 + $0x4] sm:$0x11 pattern:$0x75316420]  ;;  %v1166_v47 = vpack.i.b16 %v1157_v36, %v1157_v36 }
 0x15f   :  { %v782_v48 = vpop.f32.mrf.mxu0  ;;  %v888_v49 = vpop.f32.mrf.mxu1  ;;  %v1297_v46 = vcombine.high %v4007_v42, %v4007_v42 }
 0x160   :  { %v789_v58 = vadd.f32 %v782_v48, %v683_v51  ;;  %v1108_v51 = vpack.i.b16 %v1099_v40, %v1099_v40 }
 0x161   :  { %v784_v52 = vpop.f32.mrf.mxu0  ;;  %v890_v53 = vpop.f32.mrf.mxu1  ;;  %v1311_v60 = vrot.slane %v1297_v46, %v4290_v16 }
 0x162   :  { %v790_v63 = vadd.f32 %v784_v52, %v684_v54  ;;  %v895_v4 = vadd.f32 %v888_v49, %v789_v58  ;;  %v1496_v49 = vcombine.high %v4017_v37, %v4017_v37  ;;  %v1304_v58 = vrot.slane %v4007_v42, %v4290_v16 }
 0x163   :  { %v786_v59 = vpop.f32.mrf.mxu0  ;;  %v892_v9 = vpop.f32.mrf.mxu1 }
 0x164   :  { %v896_v13 = vadd.f32 %v890_v53, %v790_v63  ;;  %v4595_v53 = vrot.slane %v1159_v41, %v4300_v23  ;;  %v4012_v59 = vld.sshfl [vmem:[%s5037_s2 + $0x6] sm:$0x11 pattern:$0x75316420]  ;;  %v4604_v63 = vrot.slane %v1166_v47, %v4300_v23 }
 0x165   :  { %v787_v2 = vpop.f32.mrf.mxu0  ;;  %v893_v3 = vpop.f32.mrf.mxu1 }
 0x166   :  { %v1401_v3 = vcombine.high %v4012_v59, %v4012_v59 }
 0x167   :  { %v994_v11 = vpop.f32.mrf.mxu0 }
 0x168   :  { %v1001_v14 = vadd.f32 %v994_v11, %v895_v4  ;;  %v1408_v4 = vrot.slane %v4012_v59, %v4290_v16  ;;  %v1510_v11 = vrot.slane %v1496_v49, %v4290_v16  ;;  %v1415_v33 = vrot.slane %v1401_v3, %v4290_v16  ;;  %v4032_v3 = vld.sshfl [vmem:[%s5037_s2 + $0xe] sm:$0x11 pattern:$0x75316420] }
 0x169   :  { %v996_v5 = vpop.f32.mrf.mxu0 }
 0x16a   :  { %v1002_v15 = vadd.f32 %v996_v5, %v896_v13  ;;  %v1009_v17 = vadd.f32 %v1007_v12, %v1001_v14  ;;  %v1503_v13 = vrot.slane %v4017_v37, %v4290_v16  ;;  %v1113_v14 = vrot.slane %v1108_v51, %v4300_v23 }
 0x16b   :  { %v998_v18 = vpop.f32.mrf.mxu0  ;;  %v1417_v36 = vpack.i.b16 %v1408_v4, %v1408_v4 }
 0x16c   :  { %v1010_v19 = vadd.f32 %v1007_v12, %v1002_v15  ;;  %v1011_v21 = vmax.f32 %v1009_v17, 0.0  ;;  %v4022_v12 = vld.sshfl [vmem:[%s5037_s2 + $0xa] sm:$0x11 pattern:$0x75316420]  ;;  %v1313_v15 = vpack.i.b16 %v1304_v58, %v1304_v58  ;;  %v1512_v37 = vpack.i.b16 %v1503_v13, %v1503_v13 }
 0x16d   :  { %v999_v24 = vpop.f32.mrf.mxu0 }
 0x16e   :  { %v1012_v25 = vmax.f32 %v1010_v19, 0.0  ;;  %v4496_v26 = vpack.c.bf16 %v1011_v21, %v1011_v21  ;;  %v1320_v24 = vpack.i.b16 %v1311_v60, %v1311_v60  ;;  %v1318_v41 = vrot.slane %v1313_v15, %v4300_v23 }
 0x16f   :  { %v1607_v60 = vrot.slane %v4022_v12, %v4290_v16 }
 0x170   :  { %1074 = vrot.lane.b32.xlu0 %v4496_v26, %s4169_s11  ;;  %1124 = vrot.lane.b32.xlu1 %v4496_v26, %s4170_s12  ;;  %v4502_v27 = vpack.c.bf16 %v1012_v25, %v1012_v25  ;;  %v4027_v25 = vld.sshfl [vmem:[%s5037_s2 + $0xc] sm:$0x11 pattern:$0x75316420]  ;;  %v1325_v58 = vrot.slane %v1320_v24, %v4300_v23  ;;  %v1123_v24 = vld [vmem:[%s5040_s5] sm:$0xf] }
 0x171   :  { %v1711_v15 = vrot.slane %v4027_v25, %v4290_v16 }
 0x174   :  { %1278 = vrot.lane.b32.xlu0 %v4496_v26, %s4171_s13  ;;  %1126 = vrot.lane.b32.xlu1 %v4502_v27, %s4170_s12 }
 0x178   :  { %1382 = vrot.lane.b32.xlu0 %v4496_v26, %s4172_s14  ;;  %1076 = vrot.lane.b32.xlu1 %v4502_v27, %s4169_s11 }
 0x17c   :  { %1581 = vrot.lane.b32.xlu0 %v4496_v26, %s4173_s15  ;;  %1280 = vrot.lane.b32.xlu1 %v4502_v27, %s4171_s13 }
 0x180   :  { %1685 = vrot.lane.b32.xlu0 %v4496_v26, %s4174_s16  ;;  %1384 = vrot.lane.b32.xlu1 %v4502_v27, %s4172_s14 }
 0x184   :  { %1789 = vrot.lane.b32.xlu0 %v4496_v26, %s4175_s17  ;;  %1583 = vrot.lane.b32.xlu1 %v4502_v27, %s4173_s15 }
 0x188   :  { %1893 = vrot.lane.b32.xlu0 %v4496_v26, %s4176_s18  ;;  %1687 = vrot.lane.b32.xlu1 %v4502_v27, %s4174_s16 }
 0x18c   :  { %2072 = vrot.lane.b32.xlu0 %v4535_v28, %s4170_s12  ;;  %1791 = vrot.lane.b32.xlu1 %v4502_v27, %s4175_s17 }
 0x190   :  { %2022 = vrot.lane.b32.xlu0 %v4535_v28, %s4169_s11  ;;  %1895 = vrot.lane.b32.xlu1 %v4502_v27, %s4176_s18 }
 0x194   :  { %2222 = vrot.lane.b32.xlu0 %v4535_v28, %s4171_s13  ;;  %2074 = vrot.lane.b32.xlu1 %v4547_v29, %s4170_s12 }
 0x198   :  { %2324 = vrot.lane.b32.xlu0 %v4535_v28, %s4172_s14  ;;  %2024 = vrot.lane.b32.xlu1 %v4547_v29, %s4169_s11 }
 0x19c   :  { %2538 = vrot.lane.b32.xlu0 %v4535_v28, %s4173_s15  ;;  %2224 = vrot.lane.b32.xlu1 %v4547_v29, %s4171_s13 }
 0x1a0   :  { %2640 = vrot.lane.b32.xlu0 %v4535_v28, %s4174_s16  ;;  %2326 = vrot.lane.b32.xlu1 %v4547_v29, %s4172_s14 }
 0x1a4   :  { %2742 = vrot.lane.b32.xlu0 %v4535_v28, %s4175_s17  ;;  %2540 = vrot.lane.b32.xlu1 %v4547_v29, %s4173_s15 }
 0x1a8   :  { %2844 = vrot.lane.b32.xlu0 %v4535_v28, %s4176_s18  ;;  %2642 = vrot.lane.b32.xlu1 %v4547_v29, %s4174_s16 }
 0x1ac   :  { %2949 = vperm.xlu0 %4143, %v4284_v10   ;;  %2744 = vrot.lane.b32.xlu1 %v4547_v29, %s4175_s17  ;;  %v1092_v10 = vcombine.high %v3998_v34, %v3998_v34  ;;  %v1600_v34 = vcombine.high %v4022_v12, %v4022_v12 }
 0x1ae   :  { %v1106_v48 = vrot.slane %v1092_v10, %v4290_v16  ;;  %v1519_v10 = vpack.i.b16 %v1510_v11, %v1510_v11  ;;  %v4641_v11 = vrot.slane %v1512_v37, %v4300_v23 }
 0x1b0   :  { %2846 = vrot.lane.b32.xlu1 %v4547_v29, %s4176_s18  ;;  %v1115_v2 = vpack.i.b16 %v1106_v48, %v1106_v48  ;;  %v1704_v48 = vcombine.high %v4027_v25, %v4027_v25  ;;  %v4638_v4 = vrot.slane %v1519_v10, %v4300_v23  ;;  %v1525_v10 = vmul.bf16 %v4641_v11, %v4496_v26  ;;  %v4008_v26 = vld [vmem:[%s5040_s5 + $0x8] sm:$0xf] }
 0x1b2   :  { %v1120_v32 = vrot.slane %v1115_v2, %v4300_v23  ;;  %v1614_v2 = vrot.slane %v1600_v34, %v4290_v16  ;;  %v1616_v34 = vpack.i.b16 %v1607_v60, %v1607_v60  ;;  %v1526_v25 = vmul.bf16 %v4638_v4, %v4502_v27 }
 0x1e2   :  { %v1075_v52 = vpop.permute.xlu0 %1074  ;;  %v1125_v54 = vpop.permute.xlu1 %1124 }
 0x1e3   :  { %v1131_v9 = vsel %vm101_vm1, 0, %v1125_v54  ;;  %v1081_v19 = vsel %vm48_vm0, 0, %v1075_v52 }
 0x1e4   :  { %v1172_v5 = vmul.bf16 %v4595_v53, %v1131_v9  ;;  %v1121_v40 = vmul.bf16 %v1113_v14, %v1081_v19  ;;  %v1424_v9 = vpack.i.b16 %v1415_v33, %v1415_v33 }
 0x1e6   :  { %v1279_v17 = vpop.permute.xlu0 %1278  ;;  %v1127_v18 = vpop.permute.xlu1 %1126  ;;  %v1182_v47 = vsel %vm1180_vm10, %v1172_v5, 0  ;;  %v1232_v5 = vsel %vm1180_vm10, %v1121_v40, 0  ;;  %v1429_v33 = vrot.slane %v1424_v9, %v4300_v23 }
 0x1e7   :  { %v1128_v21 = vsel %vm101_vm1, %v1125_v54, %v1127_v18  ;;  %v1285_v49 = vsel %vm257_vm3, 0, %v1279_v17  ;;  %v4001_v54 = vld [vmem:[%s5040_s5 + $0x4] sm:$0xf]  ;;  %v1718_v18 = vrot.slane %v1704_v48, %v4290_v16 }
 0x1e8   :  { %v1173_v30 = vmul.bf16 %v4604_v63, %v1128_v21  ;;  %v1326_v13 = vmul.bf16 %v1318_v41, %v1285_v49  ;;  %v1815_v49 = vrot.slane %v4032_v3, %v4290_v16 }
 0x1e9   :  { %v1727_v48 = vpack.i.b16 %v1718_v18, %v1718_v18 }
 0x1ea   :  { %v1383_v42 = vpop.permute.xlu0 %1382  ;;  %4002 = vmatprep.subr.msk.bf16.mxu0 %vm1180_vm10, %v1173_v30  ;;  %v1077_v46 = vpop.permute.xlu1 %1076  ;;  %v1808_v30 = vcombine.high %v4032_v3, %v4032_v3  ;;  %v1533_v3 = vsel %vm1180_vm10, %v1525_v10, 0  ;;  %v1824_v18 = vpack.i.b16 %v1815_v49, %v1815_v49 }
 0x1eb   :  { %v1078_v51 = vsel %vm48_vm0, %v1075_v52, %v1077_v46  ;;  %1202 = vmatpush1.bf16.msra.mxu0 %v1182_v47  ;;  %v1422_v52 = vrot.slane %v1417_v36, %v4300_v23  ;;  %v1389_v19 = vsel %vm363_vm5, 0, %v1383_v42  ;;  %v1623_v36 = vpack.i.b16 %v1614_v2, %v1614_v2 }
 0x1ec   :  { %v1122_v59 = vmul.bf16 %v1120_v32, %v1078_v51  ;;  %v1334_v46 = vsel %vm1180_vm10, %v1326_v13, 0  ;;  %v1720_v47 = vpack.i.b16 %v1711_v15, %v1711_v15  ;;  %v1822_v51 = vrot.slane %v1808_v30, %v4290_v16  ;;  %v4013_v15 = vld [vmem:[%s5040_s5 + $0xc] sm:$0xf] }
 0x1ed   :  { %v1430_v37 = vmul.bf16 %v1422_v52, %v1389_v19  ;;  %v4687_v13 = vrot.slane %v1727_v48, %v4300_v23  ;;  %v4705_v10 = vrot.slane %v1824_v18, %v4300_v23 }
 0x1ee   :  { %v1582_v14 = vpop.permute.xlu0 %1581  ;;  %4003 = vmatmul.mubr.msk.bf16.vlgmr.msra.gmra.mxu0 %vm1176_vm11, %v4001_v54  ;;  %4004 = vmatprep.subr.msk.bf16.mxu1 %vm1180_vm10, %v1122_v59  ;;  %v1281_v12 = vpop.permute.xlu1 %1280  ;;  %v4677_v59 = vrot.slane %v1623_v36, %v4300_v23  ;;  %v4684_v52 = vrot.slane %v1720_v47, %v4300_v23  ;;  %v1831_v19 = vpack.i.b16 %v1822_v51, %v1822_v51 }
 0x1ef   :  { %v1282_v21 = vsel %vm257_vm3, %v1279_v17, %v1281_v12  ;;  %1252 = vmatpush1.bf16.msra.mxu1 %v1232_v5  ;;  %1371 = vmatprep.mubr.bf16.mxu0 %v4168_v7  ;;  %v4037_v17 = vld.sshfl [vmem:[%s5037_s2 + $0x10] sm:$0x11 pattern:$0x75316420]  ;;  %v1438_v2 = vsel %vm1180_vm10, %v1430_v37, 0 }
 0x1f0   :  { %v1327_v32 = vmul.bf16 %v1325_v58, %v1282_v21  ;;  %v4674_v58 = vrot.slane %v1616_v34, %v4300_v23  ;;  %v1919_v30 = vrot.slane %v4037_v17, %v4290_v16  ;;  %v4018_v37 = vld [vmem:[%s5040_s5 + $0x10] sm:$0xf] }
 0x1f2   :  { %v1686_v40 = vpop.permute.xlu0 %1685  ;;  %4005 = vmatmul.mubr.msk.bf16.vlgmr.msra.gmra.mxu1 %vm1176_vm11, %v1123_v24  ;;  %4009 = vmatprep.subr.msk.bf16.mxu0 %vm1180_vm10, %v1327_v32  ;;  %v1385_v41 = vpop.permute.xlu1 %1384 }
 0x1f3   :  { %v1386_v27 = vsel %vm363_vm5, %v1383_v42, %v1385_v41  ;;  %1354 = vmatpush1.bf16.msra.mxu0 %v1334_v46  ;;  %1475 = vmatprep.mubr.bf16.mxu1 %v4168_v7  ;;  %v1912_v42 = vcombine.high %v4037_v17, %v4037_v17  ;;  %v4708_v17 = vrot.slane %v1831_v19, %v4300_v23 }
 0x1f4   :  { %v1431_v54 = vmul.bf16 %v1429_v33, %v1386_v27  ;;  %4019 = vmatprep.subr.msk.bf16.mxu0 %vm1180_vm10, %v1526_v25 }
 0x1f6   :  { %v1790_v9 = vpop.permute.xlu0 %1789  ;;  %4010 = vmatmul.mubr.msk.bf16.vlgmr.msra.gmra.mxu0 %vm1176_vm11, %v4008_v26  ;;  %4014 = vmatprep.subr.msk.bf16.mxu1 %vm1180_vm10, %v1431_v54  ;;  %v1584_v60 = vpop.permute.xlu1 %1583  ;;  %v4023_v54 = vld [vmem:[%s5040_s5 + $0x14] sm:$0xf] }
 0x1f7   :  { %v1585_v12 = vsel %vm583_vm6, %v1582_v14, %v1584_v60  ;;  %v1588_v5 = vsel %vm583_vm6, %v1584_v60, 0  ;;  %1458 = vmatpush1.bf16.msra.mxu1 %v1438_v2  ;;  %1553 = vmatpush1.bf16.msra.mxu0 %v1533_v3  ;;  %v1926_v14 = vrot.slane %v1912_v42, %v4290_v16 }
 0x1f8   :  { %v1629_v21 = vmul.bf16 %v4674_v58, %v1585_v12  ;;  %v1630_v24 = vmul.bf16 %v4677_v59, %v1588_v5  ;;  %1570 = vmatprep.mubr.bf16.mxu0 %v4168_v7 }
 0x1f9   :  { %v1935_v47 = vpack.i.b16 %v1926_v14, %v1926_v14 }
 0x1fa   :  { %v1894_v32 = vpop.permute.xlu0 %1893  ;;  %4015 = vmatmul.mubr.msk.bf16.vlgmr.msra.gmra.mxu1 %vm1176_vm11, %v4013_v15  ;;  %4024 = vmatprep.subr.msk.bf16.mxu1 %vm1180_vm10, %v1630_v24  ;;  %v1688_v33 = vpop.permute.xlu1 %1687  ;;  %v1637_v34 = vsel %vm1180_vm10, %v1629_v21, 0  ;;  %v4028_v21 = vld [vmem:[%s5040_s5 + $0x18] sm:$0xf] }
 0x1fb   :  { %v1689_v36 = vsel %vm689_vm7, %v1686_v40, %v1688_v33  ;;  %v1692_v25 = vsel %vm689_vm7, %v1688_v33, 0  ;;  %1657 = vmatpush1.bf16.msra.mxu1 %v1637_v34  ;;  %1674 = vmatprep.mubr.bf16.mxu1 %v4168_v7  ;;  %v1928_v40 = vpack.i.b16 %v1919_v30, %v1919_v30  ;;  %v4731_v3 = vrot.slane %v1935_v47, %v4300_v23 }
 0x1fc   :  { %v1733_v41 = vmul.bf16 %v4684_v52, %v1689_v36  ;;  %v1734_v46 = vmul.bf16 %v4687_v13, %v1692_v25  ;;  %v4033_v25 = vld [vmem:[%s5040_s5 + $0x1c] sm:$0xf] }
 0x1fd   :  { %v4728_v2 = vrot.slane %v1928_v40, %v4300_v23  ;;  %v2475_v40 = vmul.bf16 %v4527_v8, %v4323_v45 }
 0x1fe   :  { %v1792_v48 = vpop.permute.xlu1 %1791  ;;  %4020 = vmatmul.mubr.msk.bf16.vlgmr.msra.gmra.mxu0 %vm1176_vm11, %v4018_v37  ;;  %4029 = vmatprep.subr.msk.bf16.mxu0 %vm1180_vm10, %v1734_v46  ;;  %v1741_v27 = vsel %vm1180_vm10, %v1733_v41, 0  ;;  %v2073_v26 = vpop.permute.xlu0 %2072 }
 0x1ff   :  { %v1793_v49 = vsel %vm795_vm8, %v1790_v9, %v1792_v48  ;;  %v1796_v51 = vsel %vm795_vm8, %v1792_v48, 0  ;;  %1761 = vmatpush1.bf16.msra.mxu0 %v1741_v27  ;;  %1778 = vmatprep.mubr.bf16.mxu0 %v4168_v7  ;;  %v2079_v9 = vsel %vm101_vm1, 0, %v2073_v26 }
 0x200   :  { %v1837_v42 = vmul.bf16 %v4705_v10, %v1793_v49  ;;  %v1838_v60 = vmul.bf16 %v4708_v17, %v1796_v51  ;;  %v2119_v14 = vmul.bf16 %v2079_v9, %v4326_v50  ;;  %v2484_v49 = vrot.slane %v2475_v40, %v4235_v6  ;;  %v4062_v40 = vld [vmem:[%s5038_s3 + $0x10] sm:$0xf] }
 0x202   :  { %4025 = vmatmul.mubr.msk.bf16.vlgmr.msra.gmra.mxu1 %vm1176_vm11, %v4023_v54  ;;  %4034 = vmatprep.subr.msk.bf16.mxu1 %vm1180_vm10, %v1838_v60  ;;  %v1896_v12 = vpop.permute.xlu1 %1895  ;;  %v1845_v5 = vsel %vm1180_vm10, %v1837_v42, 0  ;;  %v2023_v15 = vpop.permute.xlu0 %2022  ;;  %v2126_v46 = vsel %vm155_vm2, %v2119_v14, 0  ;;  %v4045_v42 = vld [vmem:[%s5038_s3 + $0x4] sm:$0xf] }
 0x203   :  { %v1897_v18 = vsel %vm901_vm9, %v1894_v32, %v1896_v12  ;;  %v1900_v19 = vsel %vm901_vm9, %v1896_v12, 0  ;;  %1865 = vmatpush1.bf16.msra.mxu1 %v1845_v5  ;;  %1882 = vmatprep.mubr.bf16.mxu1 %v4168_v7  ;;  %v2029_v33 = vsel %vm48_vm0, 0, %v2023_v15  ;;  %v2485_v12 = vcombine.high %v2484_v49, %v2484_v49 }
 0x204   :  { %v1941_v24 = vmul.bf16 %v4728_v2, %v1897_v18  ;;  %v1942_v30 = vmul.bf16 %v4731_v3, %v1900_v19  ;;  %v2069_v41 = vmul.bf16 %v2029_v33, %v4317_v43  ;;  %v2071_v18 = vld [vmem:[%s5038_s3] sm:$0xf] }
 0x206   :  { %4030 = vmatmul.mubr.msk.bf16.vlgmr.msra.gmra.mxu0 %vm1176_vm11, %v4028_v21  ;;  %4039 = vmatprep.subr.msk.bf16.mxu0 %vm1180_vm10, %v1942_v30  ;;  %v1949_v32 = vsel %vm1180_vm10, %v1941_v24, 0  ;;  %v2075_v34 = vpop.permute.xlu1 %2074  ;;  %v2223_v36 = vpop.permute.xlu0 %2222  ;;  %v2176_v8 = vsel %vm155_vm2, %v2069_v41, 0  ;;  %v4052_v24 = vld [vmem:[%s5038_s3 + $0x8] sm:$0xf] }
 0x207   :  { %1969 = vmatpush1.bf16.msra.mxu0 %v1949_v32  ;;  %v2076_v37 = vsel %vm101_vm1, %v2073_v26, %v2075_v34  ;;  %1986 = vmatprep.mubr.bf16.mxu0 %v4168_v7  ;;  %v2229_v47 = vsel %vm257_vm3, 0, %v2223_v36  ;;  %v2490_v32 = vsel %vm155_vm2, %v2484_v49, 0 }
 0x208   :  { %v2120_v50 = vmul.bf16 %v2076_v37, %v4339_v57  ;;  %v4038_v57 = vld [vmem:[%s5040_s5 + $0x20] sm:$0xf]  ;;  %v2269_v45 = vmul.bf16 %v2229_v47, %v4346_v0 }
 0x20a   :  { %4035 = vmatmul.mubr.msk.bf16.vlgmr.msra.gmra.mxu1 %vm1176_vm11, %v4033_v25  ;;  %4046 = vmatprep.subr.msk.bf16.mxu1 %vm155_vm2, %v2120_v50  ;;  %v2025_v48 = vpop.permute.xlu1 %2024  ;;  %v2325_v27 = vpop.permute.xlu0 %2324  ;;  %v2276_v9 = vsel %vm155_vm2, %v2269_v45, 0 }
 0x20b   :  { %v2026_v26 = vsel %vm48_vm0, %v2023_v15, %v2025_v48  ;;  %2146 = vmatpush1.bf16.msra.mxu1 %v2126_v46  ;;  %2163 = vmatprep.mubr.bf16.mxu1 %v4168_v7  ;;  %v2331_v51 = vsel %vm363_vm5, 0, %v2325_v27 }
 0x20c   :  { %v2070_v43 = vmul.bf16 %v2026_v26, %v4336_v56  ;;  %v2371_v6 = vmul.bf16 %v2331_v51, %v4376_v31  ;;  %v4837_v51 = vpop.f32.mrf.mxu1 }
 0x20e   :  { %4040 = vmatmul.mubr.msk.bf16.vlgmr.msra.gmra.mxu0 %vm1176_vm11, %v4038_v57  ;;  %v2225_v54 = vpop.permute.xlu1 %2224  ;;  %4048 = vmatprep.subr.msk.bf16.mxu0 %vm155_vm2, %v2070_v43  ;;  %v2539_v0 = vpop.permute.xlu0 %2538  ;;  %v2378_v31 = vsel %vm155_vm2, %v2371_v6, 0  ;;  %v4067_v43 = vld [vmem:[%s5038_s3 + $0x14] sm:$0xf]  ;;  %v4082_v6 = vld [vmem:[%s5038_s3 + $0x20] sm:$0xf] }
 0x20f   :  { %v2226_v60 = vsel %vm257_vm3, %v2223_v36, %v2225_v54  ;;  %2196 = vmatpush1.bf16.msra.mxu0 %v2176_v8  ;;  %2213 = vmatprep.mubr.bf16.mxu0 %v4168_v7  ;;  %v4057_v36 = vld [vmem:[%s5038_s3 + $0xc] sm:$0xf]  ;;  %v4841_v54 = vpop.f32.mrf.mxu1 }
 0x210   :  { %v2270_v56 = vmul.bf16 %v2226_v60, %v4349_v1 }
 0x212   :  { %4047 = vmatmul.mubr.msk.bf16.vlgmr.msra.gmra.mxu1 %vm151_vm4, %v4045_v42  ;;  %4053 = vmatprep.subr.msk.bf16.mxu1 %vm155_vm2, %v2270_v56  ;;  %v2327_v5 = vpop.permute.xlu1 %2326  ;;  %v2641_v19 = vpop.permute.xlu0 %2640  ;;  %v4072_v42 = vld [vmem:[%s5038_s3 + $0x18] sm:$0xf]  ;;  %v4077_v56 = vld [vmem:[%s5038_s3 + $0x1c] sm:$0xf] }
 0x213   :  { %v2328_v15 = vsel %vm363_vm5, %v2325_v27, %v2327_v5  ;;  %2296 = vmatpush1.bf16.msra.mxu1 %v2276_v9  ;;  %2313 = vmatprep.mubr.bf16.mxu1 %v4168_v7 }
 0x214   :  { %v2372_v1 = vmul.bf16 %v2328_v15, %v4381_v35  ;;  %4063 = vmatprep.subr.msk.bf16.mxu1 %vm155_vm2, %v2485_v12 }
 0x216   :  { %4049 = vmatmul.mubr.msk.bf16.vlgmr.msra.gmra.mxu0 %vm151_vm4, %v2071_v18  ;;  %4058 = vmatprep.subr.msk.bf16.mxu0 %vm155_vm2, %v2372_v1  ;;  %v2541_v21 = vpop.permute.xlu1 %2540  ;;  %v2743_v37 = vpop.permute.xlu0 %2742 }
 0x217   :  { %2398 = vmatpush1.bf16.msra.mxu0 %v2378_v31  ;;  %2415 = vmatprep.mubr.bf16.mxu0 %v4168_v7  ;;  %v2542_v30 = vsel %vm583_vm6, %v2539_v0, %v2541_v21  ;;  %v2545_v35 = vsel %vm583_vm6, %v2541_v21, 0 }
 0x218   :  { %v2585_v14 = vmul.bf16 %v2542_v30, %v4387_v38  ;;  %v2586_v33 = vmul.bf16 %v2545_v35, %v4402_v55 }
 0x21a   :  { %4054 = vmatmul.mubr.msk.bf16.vlgmr.msra.gmra.mxu1 %vm151_vm4, %v4052_v24  ;;  %v2643_v34 = vpop.permute.xlu1 %2642  ;;  %4068 = vmatprep.subr.msk.bf16.mxu0 %vm155_vm2, %v2586_v33  ;;  %v2592_v41 = vsel %vm155_vm2, %v2585_v14, 0  ;;  %v2845_v26 = vpop.permute.xlu0 %2844 }
 0x21b   :  { %2510 = vmatpush1.bf16.msra.mxu1 %v2490_v32  ;;  %2527 = vmatprep.mubr.bf16.mxu1 %v4168_v7  ;;  %v2644_v25 = vsel %vm689_vm7, %v2641_v19, %v2643_v34  ;;  %v2647_v38 = vsel %vm689_vm7, %v2643_v34, 0 }
 0x21c   :  { %v2687_v55 = vmul.bf16 %v2644_v25, %v4411_v62  ;;  %v2688_v50 = vmul.bf16 %v2647_v38, %v4408_v61 }
 0x21e   :  { %4059 = vmatmul.mubr.msk.bf16.vlgmr.msra.gmra.mxu0 %vm151_vm4, %v4057_v36  ;;  %4073 = vmatprep.subr.msk.bf16.mxu1 %vm155_vm2, %v2688_v50  ;;  %v2745_v46 = vpop.permute.xlu1 %2744  ;;  %v2694_v27 = vsel %vm155_vm2, %v2687_v55, 0 }
 0x21f   :  { %2612 = vmatpush1.bf16.msra.mxu0 %v2592_v41  ;;  %2629 = vmatprep.mubr.bf16.mxu0 %v4168_v7  ;;  %v2746_v47 = vsel %vm795_vm8, %v2743_v37, %v2745_v46  ;;  %v2749_v62 = vsel %vm795_vm8, %v2745_v46, 0 }
 0x220   :  { %v2789_v61 = vmul.bf16 %v2746_v47, %v4430_v22  ;;  %v2790_v48 = vmul.bf16 %v2749_v62, %v4436_v20 }
 0x222   :  { %4064 = vmatmul.mubr.msk.bf16.vlgmr.msra.gmra.mxu1 %vm151_vm4, %v4062_v40  ;;  %v2847_v57 = vpop.permute.xlu1 %2846  ;;  %4078 = vmatprep.subr.msk.bf16.mxu0 %vm155_vm2, %v2790_v48  ;;  %v2796_v49 = vsel %vm155_vm2, %v2789_v61, 0 }
 0x223   :  { %2714 = vmatpush1.bf16.msra.mxu1 %v2694_v27  ;;  %2731 = vmatprep.mubr.bf16.mxu1 %v4168_v7  ;;  %v2848_v45 = vsel %vm901_vm9, %v2845_v26, %v2847_v57  ;;  %v2851_v22 = vsel %vm901_vm9, %v2847_v57, 0 }
 0x224   :  { %v2891_v20 = vmul.bf16 %v2848_v45, %v4458_v44  ;;  %v2892_v8 = vmul.bf16 %v2851_v22, %v4452_v39  ;;  %v1069_v39 = vpop.f32.mrf.mxu1 }
 0x226   :  { %4069 = vmatmul.mubr.msk.bf16.vlgmr.msra.gmra.mxu0 %vm151_vm4, %v4067_v43  ;;  %4083 = vmatprep.subr.msk.bf16.mxu1 %vm155_vm2, %v2892_v8  ;;  %v2898_v44 = vsel %vm155_vm2, %v2891_v20, 0  ;;  %v1070_v60 = vpop.f32.mrf.mxu1 }
 0x227   :  { %2816 = vmatpush1.bf16.msra.mxu0 %v2796_v49  ;;  %2833 = vmatprep.mubr.bf16.mxu0 %v4168_v7 }
 0x228   :  { %4085 = vmatprep.subr.msk.bf16.mxu0 %vm155_vm2, %v4547_v29 }
 0x22a   :  { %4074 = vmatmul.mubr.msk.bf16.vlgmr.msra.gmra.mxu1 %vm151_vm4, %v4072_v42 }
 0x22b   :  { %2918 = vmatpush1.bf16.msra.mxu1 %v2898_v44  ;;  %2935 = vmatprep.mubr.bf16.mxu1 %v4168_v7 }
 0x22e   :  { %4079 = vmatmul.mubr.msk.bf16.vlgmr.msra.gmra.mxu0 %vm151_vm4, %v4077_v56 }
 0x22f   :  { %3006 = vmatprep.mubr.bf16.mxu0 %v4168_v7 }
 0x232   :  { %4084 = vmatmul.mubr.msk.bf16.vlgmr.msra.gmra.mxu1 %vm151_vm4, %v4082_v6 }
 0x233   :  { %3158 = vmatprep.mubr.bf16.mxu1 %v4168_v7 }
 0x2ae   :  { %v1221_v29 = vpop.f32.mrf.mxu0 }
 0x2b0   :  { %v1223_v0 = vpop.f32.mrf.mxu0 }
 0x2b2   :  { %v1225_v9 = vpop.f32.mrf.mxu0  ;;  %v1271_v12 = vpop.f32.mrf.mxu1 }
 0x2b3   :  { %v1272_v5 = vadd.f32 %v1271_v12, %v1221_v29 }
 0x2b4   :  { %v1226_v15 = vpop.f32.mrf.mxu0  ;;  %v1273_v18 = vpop.f32.mrf.mxu1 }
 0x2b5   :  { %v1274_v1 = vadd.f32 %v1273_v18, %v1223_v0 }
 0x2b6   :  { %v1275_v31 = vpop.f32.mrf.mxu1  ;;  %v1373_v19 = vpop.f32.mrf.mxu0 }
 0x2b7   :  { %v1380_v21 = vadd.f32 %v1373_v19, %v1272_v5 }
 0x2b8   :  { %v1276_v24 = vpop.f32.mrf.mxu1  ;;  %v1375_v30 = vpop.f32.mrf.mxu0 }
 0x2b9   :  { %v1381_v35 = vadd.f32 %v1375_v30, %v1274_v1 }
 0x2ba   :  { %v1377_v14 = vpop.f32.mrf.mxu0  ;;  %v1477_v33 = vpop.f32.mrf.mxu1 }
 0x2bb   :  { %v1484_v32 = vadd.f32 %v1477_v33, %v1380_v21 }
 0x2bc   :  { %v1378_v34 = vpop.f32.mrf.mxu0  ;;  %v1479_v36 = vpop.f32.mrf.mxu1 }
 0x2bd   :  { %v1485_v25 = vadd.f32 %v1479_v36, %v1381_v35 }
 0x2be   :  { %v1481_v38 = vpop.f32.mrf.mxu1  ;;  %v1572_v37 = vpop.f32.mrf.mxu0 }
 0x2bf   :  { %v1579_v55 = vadd.f32 %v1572_v37, %v1484_v32 }
 0x2c0   :  { %v1482_v50 = vpop.f32.mrf.mxu1  ;;  %v1574_v41 = vpop.f32.mrf.mxu0 }
 0x2c1   :  { %v1580_v46 = vadd.f32 %v1574_v41, %v1485_v25 }
 0x2c2   :  { %v1576_v40 = vpop.f32.mrf.mxu0  ;;  %v1676_v47 = vpop.f32.mrf.mxu1 }
 0x2c3   :  { %v1683_v62 = vadd.f32 %v1676_v47, %v1579_v55 }
 0x2c4   :  { %v1577_v61 = vpop.f32.mrf.mxu0  ;;  %v1678_v48 = vpop.f32.mrf.mxu1 }
 0x2c5   :  { %v1684_v27 = vadd.f32 %v1678_v48, %v1580_v46 }
 0x2c6   :  { %v1680_v26 = vpop.f32.mrf.mxu1  ;;  %v1780_v57 = vpop.f32.mrf.mxu0 }
 0x2c7   :  { %v1787_v43 = vadd.f32 %v1780_v57, %v1683_v62 }
 0x2c8   :  { %v1681_v45 = vpop.f32.mrf.mxu1  ;;  %v1782_v22 = vpop.f32.mrf.mxu0 }
 0x2c9   :  { %v1788_v20 = vadd.f32 %v1782_v22, %v1684_v27 }
 0x2ca   :  { %v1784_v8 = vpop.f32.mrf.mxu0  ;;  %v1884_v49 = vpop.f32.mrf.mxu1 }
 0x2cb   :  { %v1891_v42 = vadd.f32 %v1884_v49, %v1787_v43  ;;  %v2969_v49 = vsel %vm155_vm2, %v4535_v28, 0 }
 0x2cc   :  { %v1785_v44 = vpop.f32.mrf.mxu0  ;;  %v1886_v39 = vpop.f32.mrf.mxu1  ;;  %2989 = vmatpush1.bf16.msra.mxu0 %v2969_v49 }
 0x2cd   :  { %v1892_v60 = vadd.f32 %v1886_v39, %v1788_v20 }
 0x2ce   :  { %v1888_v56 = vpop.f32.mrf.mxu1  ;;  %v1988_v6 = vpop.f32.mrf.mxu0 }
 0x2cf   :  { %v4862_v29 = vadd.f32 %v1988_v6, %v1891_v42 }
 0x2d0   :  { %v1889_v0 = vpop.f32.mrf.mxu1  ;;  %v1990_v9 = vpop.f32.mrf.mxu0 }
 0x2d1   :  { %v4864_v12 = vadd.f32 %v1990_v9, %v1892_v60  ;;  %v2958_v0 = vld [vmem:[%s5042_s7] sm:$0xf] }
 0x2d2   :  { %v1992_v5 = vpop.f32.mrf.mxu0  ;;  %v2165_v15 = vpop.f32.mrf.mxu1  ;;  %4086 = vmatmul.mubr.msk.bf16.vlgmr.msra.gmra.mxu0 %vm151_vm4, %v2958_v0 }
 0x2d3   :  { %3208 = vmatprep.mubr.bf16.mxu0 %v4168_v7 }
 0x2d4   :  { %v1993_v18 = vpop.f32.mrf.mxu0  ;;  %v2167_v1 = vpop.f32.mrf.mxu1 }
 0x2d6   :  { %v2169_v31 = vpop.f32.mrf.mxu1  ;;  %v2215_v19 = vpop.f32.mrf.mxu0 }
 0x2d7   :  { %v2216_v41 = vadd.f32 %v2215_v19, %v2165_v15  ;;  %v2950_v31 = vpop.permute.xlu0 %2949 }
 0x2d8   :  { %v2170_v21 = vpop.f32.mrf.mxu1  ;;  %v2217_v24 = vpop.f32.mrf.mxu0 }
 0x2d9   :  { %v2218_v47 = vadd.f32 %v2217_v24, %v2167_v1 }
 0x2da   :  { %v2219_v30 = vpop.f32.mrf.mxu0  ;;  %v2315_v35 = vpop.f32.mrf.mxu1 }
 0x2db   :  { %v2322_v62 = vadd.f32 %v2315_v35, %v2216_v41  ;;  %v4087_v41 = vld.sshfl [vmem:[%s5037_s2] sm:$0x11 pattern:$0x75316420] }
 0x2dc   :  { %v2220_v14 = vpop.f32.mrf.mxu0  ;;  %v2317_v33 = vpop.f32.mrf.mxu1 }
 0x2dd   :  { %v2323_v27 = vadd.f32 %v2317_v33, %v2218_v47  ;;  %v3042_v47 = vrot.slane %v4087_v41, %v4290_v16 }
 0x2de   :  { %v2319_v32 = vpop.f32.mrf.mxu1  ;;  %v2417_v34 = vpop.f32.mrf.mxu0 }
 0x2df   :  { %v2424_v26 = vadd.f32 %v2417_v34, %v2322_v62 }
 0x2e0   :  { %v2320_v36 = vpop.f32.mrf.mxu1  ;;  %v2419_v25 = vpop.f32.mrf.mxu0 }
 0x2e1   :  { %v2425_v45 = vadd.f32 %v2419_v25, %v2323_v27  ;;  %v3051_v27 = vpack.i.b16 %v3042_v47, %v3042_v47 }
 0x2e2   :  { %v2421_v38 = vpop.f32.mrf.mxu0  ;;  %v2529_v37 = vpop.f32.mrf.mxu1 }
 0x2e3   :  { %v2536_v22 = vadd.f32 %v2529_v37, %v2424_v26 }
 0x2e4   :  { %v2422_v55 = vpop.f32.mrf.mxu0  ;;  %v2531_v50 = vpop.f32.mrf.mxu1 }
 0x2e5   :  { %v2537_v42 = vadd.f32 %v2531_v50, %v2425_v45  ;;  %v1016_v55 = vld [vmem:[%s5043_s8] sm:$0xff] }
 0x2e6   :  { %v2533_v46 = vpop.f32.mrf.mxu1  ;;  %v2631_v40 = vpop.f32.mrf.mxu0  ;;  %v1997_v50 = vld [vmem:[%s5041_s6] sm:$0xff] }
 0x2e7   :  { %v2638_v44 = vadd.f32 %v2631_v40, %v2536_v22  ;;  %v3035_v46 = vcombine.high %v4087_v41, %v4087_v41  ;;  %v4096_v40 = vld.sshfl [vmem:[%s5037_s2 + $0x4] sm:$0x11 pattern:$0x75316420] }
 0x2e8   :  { %v2534_v61 = vpop.f32.mrf.mxu1  ;;  %v2633_v48 = vpop.f32.mrf.mxu0  ;;  %v3242_v26 = vrot.slane %v4096_v40, %v4290_v16 }
 0x2e9   :  { %v2639_v56 = vadd.f32 %v2633_v48, %v2537_v42  ;;  %v3049_v62 = vrot.slane %v3035_v46, %v4290_v16  ;;  %v3235_v61 = vcombine.high %v4096_v40, %v4096_v40  ;;  %v4101_v48 = vld.sshfl [vmem:[%s5037_s2 + $0x6] sm:$0x11 pattern:$0x75316420]  ;;  %v3056_v42 = vrot.slane %v3051_v27, %v4300_v23 }
 0x2ea   :  { %v2635_v57 = vpop.f32.mrf.mxu0  ;;  %v2733_v43 = vpop.f32.mrf.mxu1  ;;  %v3337_v22 = vcombine.high %v4101_v48, %v4101_v48 }
 0x2eb   :  { %v2740_v6 = vadd.f32 %v2733_v43, %v2638_v44  ;;  %v3058_v43 = vpack.i.b16 %v3049_v62, %v3049_v62  ;;  %v3249_v45 = vrot.slane %v3235_v61, %v4290_v16  ;;  %v3251_v44 = vpack.i.b16 %v3242_v26, %v3242_v26 }
 0x2ec   :  { %v2636_v20 = vpop.f32.mrf.mxu0  ;;  %v2735_v8 = vpop.f32.mrf.mxu1 }
 0x2ed   :  { %v2741_v15 = vadd.f32 %v2735_v8, %v2639_v56  ;;  %v3063_v0 = vrot.slane %v3058_v43, %v4300_v23 }
 0x2ee   :  { %v2737_v39 = vpop.f32.mrf.mxu1  ;;  %v2835_v60 = vpop.f32.mrf.mxu0 }
 0x2ef   :  { %v2842_v18 = vadd.f32 %v2835_v60, %v2740_v6  ;;  %v3344_v39 = vrot.slane %v4101_v48, %v4290_v16 }
 0x2f0   :  { %v2738_v9 = vpop.f32.mrf.mxu1  ;;  %v2837_v5 = vpop.f32.mrf.mxu0 }
 0x2f1   :  { %v2843_v19 = vadd.f32 %v2837_v5, %v2741_v15  ;;  %v3258_v9 = vpack.i.b16 %v3249_v45, %v3249_v45  ;;  %v3351_v5 = vrot.slane %v3337_v22, %v4290_v16  ;;  %v4102_v45 = vld [vmem:[%s5040_s5 + $0xc] sm:$0xf] }
 0x2f2   :  { %v2839_v28 = vpop.f32.mrf.mxu0  ;;  %v2937_v1 = vpop.f32.mrf.mxu1 }
 0x2f3   :  { %v2944_v21 = vadd.f32 %v2937_v1, %v2842_v18  ;;  %v3256_v1 = vrot.slane %v3251_v44, %v4300_v23 }
 0x2f4   :  { %v2840_v24 = vpop.f32.mrf.mxu0  ;;  %v2939_v30 = vpop.f32.mrf.mxu1 }
 0x2f5   :  { %v2952_v35 = vadd.f32 %v2950_v31, %v2944_v21  ;;  %v2945_v14 = vadd.f32 %v2939_v30, %v2843_v19  ;;  %v3263_v24 = vrot.slane %v3258_v9, %v4300_v23  ;;  %v3360_v30 = vpack.i.b16 %v3351_v5, %v3351_v5 }
 0x2f6   :  { %v2941_v33 = vpop.f32.mrf.mxu1 }
 0x2f7   :  { %v2954_v32 = vmax.f32 %v2952_v35, 0.0  ;;  %v2953_v34 = vadd.f32 %v2950_v31, %v2945_v14  ;;  %v3353_v31 = vpack.i.b16 %v3344_v39, %v3344_v39  ;;  %v3365_v41 = vrot.slane %v3360_v30, %v4300_v23 }
 0x2f8   :  { %v2942_v36 = vpop.f32.mrf.mxu1 }
 0x2f9   :  { %v4873_v25 = vpack.c.bf16 %v2954_v32, %v2954_v32  ;;  %v2955_v38 = vmax.f32 %v2953_v34, 0.0  ;;  %v3358_v34 = vrot.slane %v3353_v31, %v4300_v23  ;;  %v4097_v23 = vld [vmem:[%s5040_s5 + $0x8] sm:$0xf] }
 0x2fb   :  { %v4875_v37 = vpack.c.bf16 %v2955_v38, %v2955_v38  ;;  %3067 = vrot.lane.b32.xlu1 %v4873_v25, %s4170_s12  ;;  %v3066_v38 = vld [vmem:[%s5040_s5] sm:$0xf]  ;;  %v3459_v48 = vmul.bf16 %v4873_v25, %v4641_v11 }
 0x2fd   :  { %3069 = vrot.lane.b32.xlu0 %v4875_v37, %s4170_s12  ;;  %v3460_v61 = vmul.bf16 %v4875_v37, %v4638_v4  ;;  %v3466_v11 = vsel %vm1180_vm10, %v3459_v48, 0 }
 0x2ff   :  { %3017 = vrot.lane.b32.xlu1 %v4873_v25, %s4169_s11 }
 0x301   :  { %3019 = vrot.lane.b32.xlu0 %v4875_v37, %s4169_s11 }
 0x303   :  { %3217 = vrot.lane.b32.xlu1 %v4873_v25, %s4171_s13 }
 0x305   :  { %3219 = vrot.lane.b32.xlu0 %v4875_v37, %s4171_s13 }
 0x307   :  { %3319 = vrot.lane.b32.xlu1 %v4873_v25, %s4172_s14 }
 0x309   :  { %3321 = vrot.lane.b32.xlu0 %v4875_v37, %s4172_s14 }
 0x30b   :  { %3514 = vrot.lane.b32.xlu1 %v4873_v25, %s4173_s15 }
 0x30d   :  { %3516 = vrot.lane.b32.xlu0 %v4875_v37, %s4173_s15 }
 0x30f   :  { %3616 = vrot.lane.b32.xlu1 %v4873_v25, %s4174_s16 }
 0x311   :  { %3618 = vrot.lane.b32.xlu0 %v4875_v37, %s4174_s16 }
 0x313   :  { %3718 = vrot.lane.b32.xlu1 %v4873_v25, %s4175_s17 }
 0x315   :  { %3720 = vrot.lane.b32.xlu0 %v4875_v37, %s4175_s17 }
 0x317   :  { %3820 = vrot.lane.b32.xlu1 %v4873_v25, %s4176_s18 }
 0x319   :  { %3822 = vrot.lane.b32.xlu0 %v4875_v37, %s4176_s18 }
 0x31b   :  { %1019 = vperm.xlu1 %4144, %v1016_v55  }
 0x31d   :  { %2000 = vperm.xlu0 %4143, %v1997_v50  }
 0x31f   :  { %2962 = vperm.xlu1 %4144, %v1016_v55  }
 0x321   :  { %3925 = vperm.xlu0 %4143, %v1997_v50  }
 0x36d   :  { %v3068_v57 = vpop.permute.xlu1 %3067 }
 0x36e   :  { %v3074_v20 = vsel %vm101_vm1, 0, %v3068_v57 }
 0x36f   :  { %v3114_v8 = vmul.bf16 %v3074_v20, %v4595_v53  ;;  %v3070_v49 = vpop.permute.xlu0 %3069 }
 0x370   :  { %v3071_v60 = vsel %vm101_vm1, %v3068_v57, %v3070_v49 }
 0x371   :  { %v3115_v56 = vmul.bf16 %v3071_v60, %v4604_v63  ;;  %v3018_v6 = vpop.permute.xlu1 %3017  ;;  %v3121_v28 = vsel %vm1180_vm10, %v3114_v8, 0  ;;  %v4090_v63 = vld [vmem:[%s5040_s5 + $0x4] sm:$0xf] }
 0x372   :  { %v3024_v15 = vsel %vm48_vm0, 0, %v3018_v6 }
 0x373   :  { %v3064_v18 = vmul.bf16 %v3056_v42, %v3024_v15  ;;  %v3020_v53 = vpop.permute.xlu0 %3019  ;;  %4091 = vmatprep.subr.msk.bf16.mxu1 %vm1180_vm10, %v3115_v56  ;;  %v4112_v15 = vld [vmem:[%s5040_s5 + $0x14] sm:$0xf] }
 0x374   :  { %v3021_v19 = vsel %vm48_vm0, %v3018_v6, %v3020_v53  ;;  %3141 = vmatpush1.bf16.msra.mxu1 %v3121_v28 }
 0x375   :  { %v3065_v21 = vmul.bf16 %v3063_v0, %v3021_v19  ;;  %v3218_v16 = vpop.permute.xlu1 %3217  ;;  %v3171_v32 = vsel %vm1180_vm10, %v3064_v18, 0  ;;  %v4117_v19 = vld [vmem:[%s5040_s5 + $0x18] sm:$0xf] }
 0x376   :  { %v3224_v35 = vsel %vm257_vm3, 0, %v3218_v16 }
 0x377   :  { %v3264_v14 = vmul.bf16 %v3256_v1, %v3224_v35  ;;  %v3220_v33 = vpop.permute.xlu0 %3219  ;;  %4092 = vmatmul.mubr.msk.bf16.vlgmr.msra.gmra.mxu1 %vm1176_vm11, %v4090_v63  ;;  %4093 = vmatprep.subr.msk.bf16.mxu0 %vm1180_vm10, %v3065_v21  ;;  %v4122_v21 = vld [vmem:[%s5040_s5 + $0x1c] sm:$0xf] }
 0x378   :  { %v3221_v36 = vsel %vm257_vm3, %v3218_v16, %v3220_v33  ;;  %3191 = vmatpush1.bf16.msra.mxu0 %v3171_v32  ;;  %3308 = vmatprep.mubr.bf16.mxu1 %v4168_v7 }
 0x379   :  { %v3265_v55 = vmul.bf16 %v3263_v24, %v3221_v36  ;;  %v3320_v50 = vpop.permute.xlu1 %3319  ;;  %v3271_v62 = vsel %vm1180_vm10, %v3264_v14, 0 }
 0x37a   :  { %v3326_v46 = vsel %vm363_vm5, 0, %v3320_v50 }
 0x37b   :  { %v3366_v40 = vmul.bf16 %v3358_v34, %v3326_v46  ;;  %v3322_v47 = vpop.permute.xlu0 %3321  ;;  %4094 = vmatmul.mubr.msk.bf16.vlgmr.msra.gmra.mxu0 %vm1176_vm11, %v3066_v38  ;;  %4098 = vmatprep.subr.msk.bf16.mxu1 %vm1180_vm10, %v3265_v55 }
 0x37c   :  { %v3323_v27 = vsel %vm363_vm5, %v3320_v50, %v3322_v47  ;;  %3291 = vmatpush1.bf16.msra.mxu1 %v3271_v62  ;;  %3410 = vmatprep.mubr.bf16.mxu0 %v4168_v7 }
 0x37d   :  { %v3367_v26 = vmul.bf16 %v3365_v41, %v3323_v27  ;;  %4108 = vmatprep.subr.msk.bf16.mxu1 %vm1180_vm10, %v3460_v61  ;;  %v3515_v57 = vpop.permute.xlu1 %3514  ;;  %v3373_v4 = vsel %vm1180_vm10, %v3366_v40, 0 }
 0x37f   :  { %v3517_v43 = vpop.permute.xlu0 %3516  ;;  %4099 = vmatmul.mubr.msk.bf16.vlgmr.msra.gmra.mxu1 %vm1176_vm11, %v4097_v23  ;;  %4103 = vmatprep.subr.msk.bf16.mxu0 %vm1180_vm10, %v3367_v26 }
 0x380   :  { %v3518_v25 = vsel %vm583_vm6, %v3515_v57, %v3517_v43  ;;  %v3521_v37 = vsel %vm583_vm6, %v3517_v43, 0  ;;  %3393 = vmatpush1.bf16.msra.mxu0 %v3373_v4  ;;  %3486 = vmatpush1.bf16.msra.mxu1 %v3466_v11 }
 0x381   :  { %v3561_v22 = vmul.bf16 %v3518_v25, %v4674_v58  ;;  %v3562_v20 = vmul.bf16 %v3521_v37, %v4677_v59  ;;  %v3617_v8 = vpop.permute.xlu1 %3616  ;;  %3503 = vmatprep.mubr.bf16.mxu1 %v4168_v7  ;;  %v4107_v58 = vld [vmem:[%s5040_s5 + $0x10] sm:$0xf] }
 0x383   :  { %v3619_v49 = vpop.permute.xlu0 %3618  ;;  %4104 = vmatmul.mubr.msk.bf16.vlgmr.msra.gmra.mxu0 %vm1176_vm11, %v4102_v45  ;;  %4113 = vmatprep.subr.msk.bf16.mxu0 %vm1180_vm10, %v3562_v20  ;;  %v3568_v42 = vsel %vm1180_vm10, %v3561_v22, 0 }
 0x384   :  { %v3620_v44 = vsel %vm689_vm7, %v3617_v8, %v3619_v49  ;;  %v3623_v39 = vsel %vm689_vm7, %v3619_v49, 0  ;;  %3588 = vmatpush1.bf16.msra.mxu0 %v3568_v42  ;;  %3605 = vmatprep.mubr.bf16.mxu0 %v4168_v7 }
 0x385   :  { %v3663_v59 = vmul.bf16 %v3620_v44, %v4684_v52  ;;  %v3664_v60 = vmul.bf16 %v3623_v39, %v4687_v13  ;;  %v3719_v56 = vpop.permute.xlu1 %3718 }
 0x387   :  { %v3721_v6 = vpop.permute.xlu0 %3720  ;;  %4109 = vmatmul.mubr.msk.bf16.vlgmr.msra.gmra.mxu1 %vm1176_vm11, %v4107_v58  ;;  %4118 = vmatprep.subr.msk.bf16.mxu1 %vm1180_vm10, %v3664_v60  ;;  %v3670_v0 = vsel %vm1180_vm10, %v3663_v59, 0 }
 0x388   :  { %v3722_v9 = vsel %vm795_vm8, %v3719_v56, %v3721_v6  ;;  %v3725_v5 = vsel %vm795_vm8, %v3721_v6, 0  ;;  %3690 = vmatpush1.bf16.msra.mxu1 %v3670_v0  ;;  %3707 = vmatprep.mubr.bf16.mxu1 %v4168_v7 }
 0x389   :  { %v3765_v52 = vmul.bf16 %v3722_v9, %v4705_v10  ;;  %v3766_v13 = vmul.bf16 %v3725_v5, %v4708_v17  ;;  %v3821_v18 = vpop.permute.xlu1 %3820 }
 0x38b   :  { %v3823_v53 = vpop.permute.xlu0 %3822  ;;  %4114 = vmatmul.mubr.msk.bf16.vlgmr.msra.gmra.mxu0 %vm1176_vm11, %v4112_v15  ;;  %4123 = vmatprep.subr.msk.bf16.mxu0 %vm1180_vm10, %v3766_v13  ;;  %v3772_v28 = vsel %vm1180_vm10, %v3765_v52, 0 }
 0x38c   :  { %v3824_v1 = vsel %vm901_vm9, %v3821_v18, %v3823_v53  ;;  %v3827_v31 = vsel %vm901_vm9, %v3823_v53, 0  ;;  %3792 = vmatpush1.bf16.msra.mxu0 %v3772_v28  ;;  %3809 = vmatprep.mubr.bf16.mxu0 %v4168_v7 }
 0x38d   :  { %v3867_v10 = vmul.bf16 %v3824_v1, %v4728_v2  ;;  %v3868_v17 = vmul.bf16 %v3827_v31, %v4731_v3  ;;  %v4127_v2 = vld [vmem:[%s5040_s5 + $0x20] sm:$0xf]  ;;  %s4178_s5 = smov [#allocation2]  }
 0x38e   :  { %s3942_s7 = sshll.u32 %s4178_s5, 4  ;;  %s3943_s7 = int_to_ptr.vmem [resolvable:$true] %s3942_s7 }
 0x38f   :  { %4119 = vmatmul.mubr.msk.bf16.vlgmr.msra.gmra.mxu1 %vm1176_vm11, %v4117_v19  ;;  %4128 = vmatprep.subr.msk.bf16.mxu1 %vm1180_vm10, %v3868_v17  ;;  %v3874_v63 = vsel %vm1180_vm10, %v3867_v10, 0  ;;  %s4145_s11 = scalar_lea.vmem %s3943_s7, 512  ;;  %p4150_p1 = scmp.lt.s32.totalorder %s3943_s7, %s3943_s7 }
 0x390   :  { %3894 = vmatpush1.bf16.msra.mxu1 %v3874_v63  ;;  %3911 = vmatprep.mubr.bf16.mxu1 %v4168_v7  ;;  %p4146_p0 = scmp.ne.s32.totalorder %s3943_s7, %s4145_s11  ;;  %p4151_p2 = scmp.lt.s32.totalorder %s4145_s11, %s4145_s11 }
 0x392   :  { %v3008_v36 = vpop.f32.mrf.mxu0  ;;  %p4152_p3 = por %p4151_p2, %p4150_p1 }
 0x393   :  { %4124 = vmatmul.mubr.msk.bf16.vlgmr.msra.gmra.mxu0 %vm1176_vm11, %v4122_v21 }
 0x394   :  { %v3010_v38 = vpop.f32.mrf.mxu0  ;;  %p4153_p4 = pnand %p4152_p3, %p4146_p0 }
 0x396   :  { %v1020_v3 = vpop.permute.xlu1 %1019  ;;  %v3012_v55 = vpop.f32.mrf.mxu0 }
 0x397   :  { %4129 = vmatmul.mubr.msk.bf16.vlgmr.msra.gmra.mxu1 %vm1176_vm11, %v4127_v2  ;;  %v1066_v24 = vadd.f32 %v4837_v51, %v1020_v3  ;;  %v1068_v30 = vadd.f32 %v4841_v54, %v1020_v3 }
 0x398   :  { %v2001_v16 = vpop.permute.xlu0 %2000  ;;  %v3013_v50 = vpop.f32.mrf.mxu0 }
 0x399   :  { %v2003_v35 = vadd.f32 %v2001_v16, %v4862_v29  ;;  %v2004_v14 = vadd.f32 %v2001_v16, %v4864_v12 }
 0x39a   :  { %v2963_v28 = vpop.permute.xlu1 %2962 }
 0x39b   :  { %v2005_v33 = vadd.f32 %v2003_v35, %v1066_v24  ;;  %v2006_v7 = vadd.f32 %v2004_v14, %v1068_v30  ;;  %v3009_v16 = vadd.f32 %v3008_v36, %v2963_v28  ;;  %v3011_v14 = vadd.f32 %v3010_v38, %v2963_v28 }
 0x39c   :  { %v3926_v17 = vpop.permute.xlu0 %3925 }
 0x39d   :  { %v2007_v32 = vmax.f32 %v2005_v33, 0.0  ;;  %v2008_v34 = vmax.f32 %v2006_v7, 0.0 }
 0x39f   :  { %2009 = vst [vmem:[#allocation2] sm:$0xff] %v2007_v32  ;;  %2010 = vst [vmem:[#allocation2 + $0x8] sm:$0xff] %v2008_v34 }
 0x437   :  { %v3160_v41 = vpop.f32.mrf.mxu1 }
 0x439   :  { %v3162_v46 = vpop.f32.mrf.mxu1 }
 0x43b   :  { %v3164_v40 = vpop.f32.mrf.mxu1  ;;  %v3210_v51 = vpop.f32.mrf.mxu0 }
 0x43c   :  { %v3211_v25 = vadd.f32 %v3210_v51, %v3160_v41 }
 0x43d   :  { %v3165_v47 = vpop.f32.mrf.mxu1  ;;  %v3212_v54 = vpop.f32.mrf.mxu0 }
 0x43e   :  { %v3213_v22 = vadd.f32 %v3212_v54, %v3162_v46 }
 0x43f   :  { %v3214_v62 = vpop.f32.mrf.mxu0  ;;  %v3310_v29 = vpop.f32.mrf.mxu1 }
 0x440   :  { %v3317_v20 = vadd.f32 %v3310_v29, %v3211_v25 }
 0x441   :  { %v3215_v61 = vpop.f32.mrf.mxu0  ;;  %v3312_v12 = vpop.f32.mrf.mxu1 }
 0x442   :  { %v3318_v42 = vadd.f32 %v3312_v12, %v3213_v22 }
 0x443   :  { %v3314_v48 = vpop.f32.mrf.mxu1  ;;  %v3412_v27 = vpop.f32.mrf.mxu0 }
 0x444   :  { %v3419_v44 = vadd.f32 %v3412_v27, %v3317_v20 }
 0x445   :  { %v3315_v23 = vpop.f32.mrf.mxu1  ;;  %v3414_v26 = vpop.f32.mrf.mxu0 }
 0x446   :  { %v3420_v59 = vadd.f32 %v3414_v26, %v3318_v42 }
 0x447   :  { %v3416_v57 = vpop.f32.mrf.mxu0  ;;  %v3505_v43 = vpop.f32.mrf.mxu1 }
 0x448   :  { %v3512_v60 = vadd.f32 %v3505_v43, %v3419_v44 }
 0x449   :  { %v3417_v4 = vpop.f32.mrf.mxu0  ;;  %v3507_v11 = vpop.f32.mrf.mxu1 }
 0x44a   :  { %v3513_v0 = vadd.f32 %v3507_v11, %v3420_v59 }
 0x44b   :  { %v3509_v37 = vpop.f32.mrf.mxu1  ;;  %v3607_v45 = vpop.f32.mrf.mxu0 }
 0x44c   :  { %v3614_v9 = vadd.f32 %v3607_v45, %v3512_v60 }
 0x44d   :  { %v3510_v8 = vpop.f32.mrf.mxu1  ;;  %v3609_v49 = vpop.f32.mrf.mxu0 }
 0x44e   :  { %v3615_v52 = vadd.f32 %v3609_v49, %v3513_v0 }
 0x44f   :  { %v3611_v39 = vpop.f32.mrf.mxu0  ;;  %v3709_v58 = vpop.f32.mrf.mxu1 }
 0x450   :  { %v3716_v13 = vadd.f32 %v3709_v58, %v3614_v9 }
 0x451   :  { %v3612_v56 = vpop.f32.mrf.mxu0  ;;  %v3711_v6 = vpop.f32.mrf.mxu1 }
 0x452   :  { %v3717_v1 = vadd.f32 %v3711_v6, %v3615_v52 }
 0x453   :  { %v3713_v5 = vpop.f32.mrf.mxu1  ;;  %v3811_v15 = vpop.f32.mrf.mxu0 }
 0x454   :  { %v3818_v31 = vadd.f32 %v3811_v15, %v3716_v13 }
 0x455   :  { %v3714_v18 = vpop.f32.mrf.mxu1  ;;  %v3813_v53 = vpop.f32.mrf.mxu0 }
 0x456   :  { %v3819_v63 = vadd.f32 %v3813_v53, %v3717_v1 }
 0x457   :  { %v3913_v19 = vpop.f32.mrf.mxu1  ;;  %v3815_v10 = vpop.f32.mrf.mxu0 }
 0x458   :  { %v3920_v21 = vadd.f32 %v3913_v19, %v3818_v31 }
 0x459   :  { %v3915_v2 = vpop.f32.mrf.mxu1  ;;  %v3816_v3 = vpop.f32.mrf.mxu0 }
 0x45a   :  { %v3928_v24 = vadd.f32 %v3926_v17, %v3920_v21  ;;  %v3921_v30 = vadd.f32 %v3915_v2, %v3819_v63 }
 0x45b   :  { %v3917_v35 = vpop.f32.mrf.mxu1 }
 0x45c   :  { %v3930_v33 = vadd.f32 %v3928_v24, %v3009_v16  ;;  %v3929_v7 = vadd.f32 %v3926_v17, %v3921_v30 }
 0x45d   :  { %v3918_v32 = vpop.f32.mrf.mxu1 }
 0x45e   :  { %v3932_v34 = vmax.f32 %v3930_v33, 0.0  ;;  %v3931_v55 = vadd.f32 %v3929_v7, %v3011_v14 }
 0x460   :  { %3935 = vst [vmem:[#allocation2 + $0x10] sm:$0xff] %v3932_v34  ;;  %v3933_v50 = vmax.f32 %v3931_v55, 0.0 }
 0x462   :  { %3936 = vst [vmem:[#allocation2 + $0x18] sm:$0xff] %v3933_v50 }
 0x463   :  { %4156 = shalt.err (!%p4153_p4)
}
 0x464   :  { %s4179_s13 = smov 256  }
 0x465   :  { %3948 = dma.vmem_to_hbm [thread:$0]  %s3943_s7, 512, %s5044_s9, [#allocation3], %s4179_s13, %s4179_s13, %s4170_s12  }
 0x466   :  { %4165 = dma.done.wait [#allocation3], 512  }
 0x467   :  { %4166 = vsyncadd [#allocation3], 4294966784 }
 0x468   :  { %3952 = vsyncpa [#allocation3], 1 }

</bundles_post_ra>
